<compile_context>
chip_gen: v5e
topology: v5e:2x2
jax: 0.10.0
libtpu: 0.0.40
codegen_flags: <defaults>
</compile_context>

<pallas_src>
import math

import numpy as np
import jax
import jax.numpy as jnp
from jax.experimental import pallas as pl
from jax.experimental.pallas import tpu as pltpu

KSIZE = 4   # ConvTranspose2d kernel_size
EPS = 1e-5  # BatchNorm2d eps

# output parity -> {input row/col offset d : kernel tap index} for stride=2, padding=1, k=4:
#   out[2m]   = x[m] @ w[1] + x[m-1] @ w[3]     (parity 0 uses offsets {0, -1})
#   out[2m+1] = x[m] @ w[2] + x[m+1] @ w[0]     (parity 1 uses offsets {0, +1})
_TAP = {(0, 0): 1, (0, -1): 3, (1, 0): 2, (1, 1): 0}


# --------------------------------- Pallas kernels ---------------------------------
def _convmm_kernel(p_ref, w_ref, y_ref, stats_ref):
    """One (tm, 9*Cin) x (9*Cin, 4*Cout) tile: the transposed conv for all four output
    parities at once.  bf16 streams, f32 MXU accumulate.  Also emits per-tile partial sums /
    sums-of-squares for train-mode BatchNorm (zero-padded tail rows contribute exact zeros
    because the conv bias has been dropped)."""
    acc = jnp.dot(p_ref[...], w_ref[...], preferred_element_type=jnp.float32)
    y_ref[...] = acc.astype(y_ref.dtype)                      # bf16 intermediate
    s1 = jnp.sum(acc, axis=0, keepdims=True)
    s2 = jnp.sum(acc * acc, axis=0, keepdims=True)
    stats_ref[...] = jnp.concatenate([s1, s2], axis=0)        # single (2, 4*Cout) store


def _bn_relu_kernel(y_ref, scale_ref, shift_ref, o_ref):
    """Fused BatchNorm affine + ReLU on a lane-dense flat view of the conv output."""
    y = y_ref[...].astype(jnp.float32)
    o_ref[...] = jnp.maximum(y * scale_ref[...] + shift_ref[...], 0.0)


# --------------------------------- helpers ---------------------------------
def _round_up(x, m):
    return (x + m - 1) // m * m


def _shift2d(x_nhwc, dy, dx):
    """out[n, i, j, c] = x[n, i+dy, j+dx, c] with zeros outside; dy, dx in {-1, 0, 1}."""
    n, h, w, c = x_nhwc.shape
    padded = jnp.pad(x_nhwc, ((0, 0), (1, 1), (1, 1), (0, 0)))
    return padded[:, 1 + dy:1 + dy + h, 1 + dx:1 + dx + w, :]


def _row_tile(rows, cap):
    """Largest tile <= cap that divides `rows` (multiple of 8), else the full extent."""
    if rows <= cap:
        return rows
    for t in range(cap - cap % 8, 7, -8):
        if rows % t == 0:
            return t
    return rows


# --------------------------------- forward ---------------------------------
def unet_up_forward(x, skip, weight, bias, gamma, beta):
    """x: (N, Cin, H, W); skip: (N, Cskip, 2H, 2W); weight: (Cin, Cout, 4, 4) (PyTorch IOHW).
    Returns (N, Cout + Cskip, 2H, 2W), matching UNetUp.forward (train-mode BN, dropout=0)."""
    del bias  # exactly cancelled by train-mode BatchNorm mean subtraction
    N, Cin, H, W = x.shape
    Cout = weight.shape[1]
    Ho, Wo = 2 * H, 2 * W
    Mp = N * H * W            # conv-output rows (one row = all 4 parities of one input pixel)
    M = 4 * Mp                # true per-channel element count for BN
    K9 = 9 * Cin              # shared 3x3 neighbourhood contraction
    C4 = 4 * Cout             # 4 parities stacked along lanes

    # ---- row tiling: big tiles, zero-padded tail; shrink tiles for very wide layers ----
    lane = lambda c: _round_up(c, 128)                       # VMEM lane padding of last dim
    bytes_per_row = (lane(K9) + lane(C4)) * 2                # bf16 patch row + bf16 y row
    tm = 512
    while tm > 64 and tm * bytes_per_row > (4 << 20):
        tm //= 2
    Mp_pad = _round_up(Mp, 128)
    tm = min(tm, Mp_pad)
    Mp_pad = _round_up(Mp_pad, tm)
    n_tiles = Mp_pad // tm

    # ---- shared-neighbourhood im2col: 9 shifted copies, block order g = (dy+1)*3+(dx+1) ----
    x_nhwc = jnp.transpose(x, (0, 2, 3, 1))                  # (N, H, W, Cin)
    shifts = [(dy, dx) for dy in (-1, 0, 1) for dx in (-1, 0, 1)]
    patches = jnp.concatenate([_shift2d(x_nhwc, dy, dx) for dy, dx in shifts], axis=-1)
    patches = patches.reshape(Mp, K9)
    if Mp_pad != Mp:
        patches = jnp.pad(patches, ((0, Mp_pad - Mp), (0, 0)))
    patches = patches.astype(jnp.bfloat16)                   # stream bf16

    # ---- packed weight (9*Cin, 4*Cout): parity (py,px) uses offsets {py-1,py} x {px-1,px} ----
    zero_blk = jnp.zeros((Cin, Cout), weight.dtype)
    wrows = []
    for dy, dx in shifts:
        cols = []
        for py in (0, 1):
            for px in (0, 1):
                if dy in (py - 1, py) and dx in (px - 1, px):
                    cols.append(weight[:, :, _TAP[(py, dy)], _TAP[(px, dx)]])
                else:
                    cols.append(zero_blk)
        wrows.append(jnp.concatenate(cols, axis=1))
    wmat = jnp.concatenate(wrows, axis=0).astype(jnp.bfloat16)     # (9*Cin, 4*Cout)

    # ---- kernel 1: conv matmul (all 4 parities) + per-tile BN partial sums ----
    conv_block = (tm * (lane(K9) + lane(C4)) * 2
                  + _round_up(K9, 16) * lane(C4) * 2
                  + 8 * lane(C4) * 4)
    conv_out, stats = pl.pallas_call(
        _convmm_kernel,
        out_shape=(
            jax.ShapeDtypeStruct((Mp_pad, C4), jnp.bfloat16),
            jax.ShapeDtypeStruct((n_tiles, 2, C4), jnp.float32),
        ),
        grid_spec=pltpu.PrefetchScalarGridSpec(
            num_scalar_prefetch=0,
            grid=(n_tiles,),
            in_specs=[
                pl.BlockSpec((tm, K9), lambda i: (i, 0)),
                pl.BlockSpec((K9, C4), lambda i: (0, 0)),
            ],
            out_specs=[
                pl.BlockSpec((tm, C4), lambda i: (i, 0)),
                pl.BlockSpec((None, 2, C4), lambda i: (i, 0, 0)),
            ],
        ),
        compiler_params=pltpu.CompilerParams(
            dimension_semantics=("parallel",),
            vmem_limit_bytes=int(2 * conv_block + (2 << 20)),
        ),
        cost_estimate=pl.CostEstimate(
            flops=2 * Mp_pad * K9 * C4,
            transcendentals=0,
            bytes_accessed=int(patches.size) * 2 + int(wmat.size) * 2
            + Mp_pad * C4 * 2 + n_tiles * 2 * C4 * 4,
        ),
    )(patches, wmat)

    # ---- fold partial sums into train-mode BN batch mean / biased variance (tiny glue) ----
    sums = jnp.sum(stats, axis=0).reshape(2, 4, Cout).sum(axis=1)   # fold tiles + parities
    mean = sums[0] / M                                              # true M, not padded
    var = jnp.maximum(sums[1] / M - mean * mean, 0.0)               # clamp f32 cancellation
    scale = gamma * jax.lax.rsqrt(var + EPS)
    shift = beta - mean * scale

    # ---- kernel 2: BN apply + ReLU on a lane-dense flat view of conv_out ----
    total = Mp_pad * C4
    lane_cols = (128 * C4) // math.gcd(128, C4)          # lcm(128, 4*Cout): lane-dense, channel-aligned
    while lane_cols * 2 <= 2048 and total % (lane_cols * 2) == 0:
        lane_cols *= 2
    rows_flat = total // lane_cols
    tr_cap = 256
    while tr_cap > 8 and tr_cap * lane_cols * 12 > (12 << 20):
        tr_cap //= 2
    tr = _row_tile(rows_flat, tr_cap)
    reps = lane_cols // Cout
    scale_row = jnp.tile(scale.astype(jnp.float32), reps).reshape(1, lane_cols)
    shift_row = jnp.tile(shift.astype(jnp.float32), reps).reshape(1, lane_cols)

    bn_block = tr * lane_cols * (2 + 4) + 2 * lane_cols * 4
    bn_flat = pl.pallas_call(
        _bn_relu_kernel,
        out_shape=jax.ShapeDtypeStruct((rows_flat, lane_cols), jnp.float32),
        grid_spec=pltpu.PrefetchScalarGridSpec(
            num_scalar_prefetch=0,
            grid=(rows_flat // tr,),
            in_specs=[
                pl.BlockSpec((tr, lane_cols), lambda i: (i, 0)),
                pl.BlockSpec((1, lane_cols), lambda i: (0, 0)),
                pl.BlockSpec((1, lane_cols), lambda i: (0, 0)),
            ],
            out_specs=pl.BlockSpec((tr, lane_cols), lambda i: (i, 0)),
        ),
        compiler_params=pltpu.CompilerParams(
            dimension_semantics=("parallel",),
            vmem_limit_bytes=int(2 * bn_block + (2 << 20)),
        ),
        cost_estimate=pl.CostEstimate(
            flops=3 * total, transcendentals=0,
            bytes_accessed=total * 2 + total * 4 + 2 * lane_cols * 4),
    )(conv_out.reshape(rows_flat, lane_cols), scale_row, shift_row)

    # ---- glue: interleave the 4 parities, back to NCHW, concat skip ----
    bn = bn_flat.reshape(Mp_pad, 4, Cout)[:Mp]
    bn = bn.reshape(N, H, W, 2, 2, Cout)                            # (n, h, w, py, px, c)
    bn = jnp.transpose(bn, (0, 1, 3, 2, 4, 5)).reshape(N, Ho, Wo, Cout)
    bn_nchw = jnp.transpose(bn, (0, 3, 1, 2))
    # skip is a pure passthrough -> concat in the wrapper, not inside a kernel
    return jnp.concatenate([bn_nchw, skip.astype(bn_nchw.dtype)], axis=1)


# ------------- pure-numpy reference (direct ConvTranspose2d definition, with bias) -------------
def reference_forward(x, skip, weight, bias, gamma, beta):
    x, skip, weight, bias, gamma, beta = (
        np.asarray(a, np.float32) for a in (x, skip, weight, bias, gamma, beta))
    N, Cin, H, W = x.shape
    Cout = weight.shape[1]
    Ho, Wo = 2 * H, 2 * W
    y = np.zeros((N, Cout, Ho, Wo), np.float32)
    for iy in range(H):
        for ix in range(W):
            for ky in range(KSIZE):
                for kx in range(KSIZE):
                    oy, ox = iy * 2 - 1 + ky, ix * 2 - 1 + kx
                    if 0 <= oy < Ho and 0 <= ox < Wo:
                        y[:, :, oy, ox] += x[:, :, iy, ix] @ weight[:, :, ky, kx]
    y += bias[None, :, None, None]
    mean = y.mean(axis=(0, 2, 3))
    var = y.var(axis=(0, 2, 3))
    yn = (y - mean[None, :, None, None]) / np.sqrt(var + EPS)[None, :, None, None]
    yn = gamma[None, :, None, None] * yn + beta[None, :, None, None]
    yn = np.maximum(yn, 0.0)
    return np.concatenate([yn, skip], axis=1)


if __name__ == "__main__":
    key = jax.random.PRNGKey(0)
    k1, k2, k3, k4, k5, k6 = jax.random.split(key, 6)

    # small shapes consistent with the module: in_channels=8, out_channels=8, 16x16 spatial
    N, Cin, Cout, H, W = 2, 8, 8, 16, 16
    x = jax.random.normal(k1, (N, Cin, H, W), jnp.float32)
    skip = jax.random.normal(k2, (N, Cout, 2 * H, 2 * W), jnp.float32)

    # ConvTranspose2d weight is (Cin, Cout, 4, 4) in PyTorch (IOHW)
    weight = 0.1 * jax.random.normal(k3, (Cin, Cout, KSIZE, KSIZE), jnp.float32)
    bias = 0.1 * jax.random.normal(k4, (Cout,), jnp.float32)
    gamma = 1.0 + 0.1 * jax.random.normal(k5, (Cout,), jnp.float32)
    beta = 0.1 * jax.random.normal(k6, (Cout,), jnp.float32)

    fwd = jax.jit(unet_up_forward)
    out = jax.block_until_ready(fwd(x, skip, weight, bias, gamma, beta))

    ref = reference_forward(x, skip, weight, bias, gamma, beta)
    assert out.shape == ref.shape == (N, 2 * Cout, 2 * H, 2 * W)
    err = float(np.max(np.abs(np.asarray(out, np.float32) - ref)))
    if err > 1e-1:  # bf16-streamed matmul / bf16 intermediate vs f32 numpy reference
        raise AssertionError(f"mismatch vs reference: max abs err {err}")
    print("KERNEL_OK")
</pallas_src>

<mosaic_0001>
module attributes {stable_mosaic.version = 11 : i64} {
  func.func @_convmm_kernel(%arg0: i32, %arg1: memref<512x72xbf16, #tpu.memory_space<vmem>>, %arg2: memref<72x32xbf16, #tpu.memory_space<vmem>>, %arg3: memref<512x32xbf16, #tpu.memory_space<vmem>>, %arg4: memref<1x2x32xf32, #tpu.memory_space<vmem>>) attributes {dimension_semantics = [#tpu.dimension_semantics<parallel>], iteration_bounds = array<i64: 1>, scalar_prefetch = 0 : i64, scratch_operands = 0 : i64, tpu.core_type = #tpu.core_type<tc>, window_params = [{transform_indices = @transform_0, window_bounds = array<i64: 512, 72>}, {pipeline_mode = #tpu.pipeline_mode<synchronous>, transform_indices = @transform_1, window_bounds = array<i64: 72, 32>}, {transform_indices = @transform_2, window_bounds = array<i64: 512, 32>}, {transform_indices = @transform_3, window_bounds = array<i64: 1, 2, 32>}]} {
    %c0 = arith.constant 0 : index
    %c0_0 = arith.constant 0 : index
    %0 = vector.load %arg1[%c0, %c0_0] : memref<512x72xbf16, #tpu.memory_space<vmem>>, vector<512x72xbf16>
    %c0_1 = arith.constant 0 : index
    %c0_2 = arith.constant 0 : index
    %1 = vector.load %arg2[%c0_1, %c0_2] : memref<72x32xbf16, #tpu.memory_space<vmem>>, vector<72x32xbf16>
    %cst = arith.constant dense<0.000000e+00> : vector<512x32xf32>
    %2 = tpu.matmul %0, %1, %cst {dimension_numbers = #tpu.dot_dimension_numbers<[1], [0], [0], [1], [0, 0, 1, 1], [], []>} : vector<512x72xbf16>, vector<72x32xbf16>, vector<512x32xf32> -> vector<512x32xf32>
    %3 = arith.truncf %2 : vector<512x32xf32> to vector<512x32xbf16>
    %c0_3 = arith.constant 0 : index
    %c0_4 = arith.constant 0 : index
    %4 = vector.load %arg3[%c0_3, %c0_4] : memref<512x32xbf16, #tpu.memory_space<vmem>>, vector<512x32xbf16>
    tpu.vector_store %arg3[%c0_3, %c0_4], %3 {strides = array<i32>} : memref<512x32xbf16, #tpu.memory_space<vmem>>, vector<512x32xbf16>,
    %cst_5 = arith.constant dense<0.000000e+00> : vector<32xf32>
    %5 = vector.multi_reduction <add>, %2, %cst_5 [0] : vector<512x32xf32> to vector<32xf32>
    %6 = vector.shape_cast %5 : vector<32xf32> to vector<1x32xf32>
    %7 = arith.mulf %2, %2 : vector<512x32xf32>
    %cst_6 = arith.constant dense<0.000000e+00> : vector<32xf32>
    %8 = vector.multi_reduction <add>, %7, %cst_6 [0] : vector<512x32xf32> to vector<32xf32>
    %9 = vector.shape_cast %8 : vector<32xf32> to vector<1x32xf32>
    %10 = tpu.concatenate %6, %9 in 0 : vector<1x32xf32>, vector<1x32xf32> -> vector<2x32xf32>
    %c0_7 = arith.constant 0 : index
    %c0_8 = arith.constant 0 : index
    %c0_9 = arith.constant 0 : index
    %11 = vector.load %arg4[%c0_7, %c0_8, %c0_9] : memref<1x2x32xf32, #tpu.memory_space<vmem>>, vector<1x2x32xf32>
    %12 = vector.shape_cast %11 : vector<1x2x32xf32> to vector<2x32xf32>
    %13 = vector.shape_cast %10 : vector<2x32xf32> to vector<1x2x32xf32>
    tpu.vector_store %arg4[%c0_7, %c0_8, %c0_9], %13 {strides = array<i32>} : memref<1x2x32xf32, #tpu.memory_space<vmem>>, vector<1x2x32xf32>,
    return
  }
  func.func @transform_0(%arg0: i32) -> (i32, i32) {
    %c0_i32 = arith.constant 0 : i32
    %c0_i32_0 = arith.constant 0 : i32
    return %arg0, %c0_i32 : i32, i32
  }
  func.func @transform_1(%arg0: i32) -> (i32, i32) {
    %c0_i32 = arith.constant 0 : i32
    %c0_i32_0 = arith.constant 0 : i32
    %c0_i32_1 = arith.constant 0 : i32
    return %c0_i32, %c0_i32_0 : i32, i32
  }
  func.func @transform_2(%arg0: i32) -> (i32, i32) {
    %c0_i32 = arith.constant 0 : i32
    %c0_i32_0 = arith.constant 0 : i32
    return %arg0, %c0_i32 : i32, i32
  }
  func.func @transform_3(%arg0: i32) -> (i32, i32, i32) {
    %c0_i32 = arith.constant 0 : i32
    %c0_i32_0 = arith.constant 0 : i32
    %c0_i32_1 = arith.constant 0 : i32
    return %arg0, %c0_i32, %c0_i32_0 : i32, i32, i32
  }
}

module attributes {stable_mosaic.version = 11 : i64} {
  func.func @_bn_relu_kernel(%arg0: i32, %arg1: memref<8x2048xbf16, #tpu.memory_space<vmem>>, %arg2: memref<1x2048xf32, #tpu.memory_space<vmem>>, %arg3: memref<1x2048xf32, #tpu.memory_space<vmem>>, %arg4: memref<8x2048xf32, #tpu.memory_space<vmem>>) attributes {dimension_semantics = [#tpu.dimension_semantics<parallel>], iteration_bounds = array<i64: 1>, scalar_prefetch = 0 : i64, scratch_operands = 0 : i64, tpu.core_type = #tpu.core_type<tc>, window_params = [{transform_indices = @transform_0, window_bounds = array<i64: 8, 2048>}, {pipeline_mode = #tpu.pipeline_mode<synchronous>, transform_indices = @transform_1, window_bounds = array<i64: 1, 2048>}, {pipeline_mode = #tpu.pipeline_mode<synchronous>, transform_indices = @transform_2, window_bounds = array<i64: 1, 2048>}, {transform_indices = @transform_3, window_bounds = array<i64: 8, 2048>}]} {
    %c0 = arith.constant 0 : index
    %c0_0 = arith.constant 0 : index
    %0 = vector.load %arg1[%c0, %c0_0] : memref<8x2048xbf16, #tpu.memory_space<vmem>>, vector<8x2048xbf16>
    %1 = arith.extf %0 : vector<8x2048xbf16> to vector<8x2048xf32>
    %c0_1 = arith.constant 0 : index
    %c0_2 = arith.constant 0 : index
    %2 = vector.load %arg2[%c0_1, %c0_2] : memref<1x2048xf32, #tpu.memory_space<vmem>>, vector<1x2048xf32>
    %3 = vector.broadcast %2 : vector<1x2048xf32> to vector<8x2048xf32>
    %4 = arith.mulf %1, %3 : vector<8x2048xf32>
    %c0_3 = arith.constant 0 : index
    %c0_4 = arith.constant 0 : index
    %5 = vector.load %arg3[%c0_3, %c0_4] : memref<1x2048xf32, #tpu.memory_space<vmem>>, vector<1x2048xf32>
    %6 = vector.broadcast %5 : vector<1x2048xf32> to vector<8x2048xf32>
    %7 = arith.addf %4, %6 : vector<8x2048xf32>
    %cst = arith.constant 0.000000e+00 : f32
    %8 = vector.broadcast %cst : f32 to vector<8x2048xf32>
    %9 = arith.maximumf %7, %8 : vector<8x2048xf32>
    %c0_5 = arith.constant 0 : index
    %c0_6 = arith.constant 0 : index
    %10 = vector.load %arg4[%c0_5, %c0_6] : memref<8x2048xf32, #tpu.memory_space<vmem>>, vector<8x2048xf32>
    tpu.vector_store %arg4[%c0_5, %c0_6], %9 {strides = array<i32>} : memref<8x2048xf32, #tpu.memory_space<vmem>>, vector<8x2048xf32>,
    return
  }
  func.func @transform_0(%arg0: i32) -> (i32, i32) {
    %c0_i32 = arith.constant 0 : i32
    %c0_i32_0 = arith.constant 0 : i32
    return %arg0, %c0_i32 : i32, i32
  }
  func.func @transform_1(%arg0: i32) -> (i32, i32) {
    %c0_i32 = arith.constant 0 : i32
    %c0_i32_0 = arith.constant 0 : i32
    %c0_i32_1 = arith.constant 0 : i32
    return %c0_i32, %c0_i32_0 : i32, i32
  }
  func.func @transform_2(%arg0: i32) -> (i32, i32) {
    %c0_i32 = arith.constant 0 : i32
    %c0_i32_0 = arith.constant 0 : i32
    %c0_i32_1 = arith.constant 0 : i32
    return %c0_i32, %c0_i32_0 : i32, i32
  }
  func.func @transform_3(%arg0: i32) -> (i32, i32) {
    %c0_i32 = arith.constant 0 : i32
    %c0_i32_0 = arith.constant 0 : i32
    return %arg0, %c0_i32 : i32, i32
  }
}

</mosaic_0001>

<bundles_post_ra>
// kernel: tile.18
= control target key start
LH: loop header
LB: loop body
LE: loop exit
PB: predicated region body
PF: predicated region fallthrough
CT: control target
= control target key end

     0   :  { %s208_s0 = inlined_call_operand.vmem [shape: f32[8], index: 0, kind: input, shape index: {}]   ;;  %s209_s1 = inlined_call_operand.vmem [shape: f32[256,8], index: 1, kind: output, shape index: {}]  }
   0x1   :  { %v4_v0 = vld [vmem:[%s208_s0] ss:$0 sm:$0xff] }
   0x2   :  { %5 = vst [vmem:[%s209_s1] sm:$0xff] %v4_v0 }
   0x3   :  { %68 = vst [vmem:[%s209_s1 + $0x8] sm:$0xff] %v4_v0 }
   0x4   :  { %69 = vst [vmem:[%s209_s1 + $0x10] sm:$0xff] %v4_v0 }
   0x5   :  { %70 = vst [vmem:[%s209_s1 + $0x18] sm:$0xff] %v4_v0 }
   0x6   :  { %71 = vst [vmem:[%s209_s1 + $0x20] sm:$0xff] %v4_v0 }
   0x7   :  { %72 = vst [vmem:[%s209_s1 + $0x28] sm:$0xff] %v4_v0 }
   0x8   :  { %73 = vst [vmem:[%s209_s1 + $0x30] sm:$0xff] %v4_v0 }
   0x9   :  { %74 = vst [vmem:[%s209_s1 + $0x38] sm:$0xff] %v4_v0 }
   0xa   :  { %75 = vst [vmem:[%s209_s1 + $0x40] sm:$0xff] %v4_v0 }
   0xb   :  { %76 = vst [vmem:[%s209_s1 + $0x48] sm:$0xff] %v4_v0 }
   0xc   :  { %77 = vst [vmem:[%s209_s1 + $0x50] sm:$0xff] %v4_v0 }
   0xd   :  { %78 = vst [vmem:[%s209_s1 + $0x58] sm:$0xff] %v4_v0 }
   0xe   :  { %79 = vst [vmem:[%s209_s1 + $0x60] sm:$0xff] %v4_v0 }
   0xf   :  { %80 = vst [vmem:[%s209_s1 + $0x68] sm:$0xff] %v4_v0 }
  0x10   :  { %81 = vst [vmem:[%s209_s1 + $0x70] sm:$0xff] %v4_v0 }
  0x11   :  { %82 = vst [vmem:[%s209_s1 + $0x78] sm:$0xff] %v4_v0 }
  0x12   :  { %83 = vst [vmem:[%s209_s1 + $0x80] sm:$0xff] %v4_v0 }
  0x13   :  { %84 = vst [vmem:[%s209_s1 + $0x88] sm:$0xff] %v4_v0 }
  0x14   :  { %85 = vst [vmem:[%s209_s1 + $0x90] sm:$0xff] %v4_v0 }
  0x15   :  { %86 = vst [vmem:[%s209_s1 + $0x98] sm:$0xff] %v4_v0 }
  0x16   :  { %87 = vst [vmem:[%s209_s1 + $0xa0] sm:$0xff] %v4_v0 }
  0x17   :  { %88 = vst [vmem:[%s209_s1 + $0xa8] sm:$0xff] %v4_v0 }
  0x18   :  { %89 = vst [vmem:[%s209_s1 + $0xb0] sm:$0xff] %v4_v0 }
  0x19   :  { %90 = vst [vmem:[%s209_s1 + $0xb8] sm:$0xff] %v4_v0 }
  0x1a   :  { %91 = vst [vmem:[%s209_s1 + $0xc0] sm:$0xff] %v4_v0 }
  0x1b   :  { %92 = vst [vmem:[%s209_s1 + $0xc8] sm:$0xff] %v4_v0 }
  0x1c   :  { %93 = vst [vmem:[%s209_s1 + $0xd0] sm:$0xff] %v4_v0 }
  0x1d   :  { %94 = vst [vmem:[%s209_s1 + $0xd8] sm:$0xff] %v4_v0 }
  0x1e   :  { %95 = vst [vmem:[%s209_s1 + $0xe0] sm:$0xff] %v4_v0 }
  0x1f   :  { %96 = vst [vmem:[%s209_s1 + $0xe8] sm:$0xff] %v4_v0 }
  0x20   :  { %97 = vst [vmem:[%s209_s1 + $0xf0] sm:$0xff] %v4_v0 }
  0x21   :  { %98 = vst [vmem:[%s209_s1 + $0xf8] sm:$0xff] %v4_v0 }

// kernel: tile.19
= control target key start
LH: loop header
LB: loop body
LE: loop exit
PB: predicated region body
PF: predicated region fallthrough
CT: control target
= control target key end

     0   :  { %vm6_vm0 = vcmask 1043458   ;;  %vm10_vm1 = vcmask 1045508   ;;  %vm14_vm2 = vcmask 1047558   ;;  %s43_s6 = smov 3  ;;  %s46_s7 = smov 12  ;;  %vm16_vm3 = vcmask 64512   ;;  %s1589_s0 = inlined_call_operand.vmem [shape: f32[256,8], index: 0, kind: input, shape index: {}]   ;;  %s1590_s1 = inlined_call_operand.vmem [shape: f32[1,2048], index: 1, kind: output, shape index: {}]  }
   0x1   :  { %v862_v0 = vld [vmem:[%s1589_s0 + $0xf] ss:$16 sm:%s43_s6]   ;;  %s51_s12 = smov 48  ;;  %s56_s13 = smov 192  ;;  %vm62_vm4 = vcmask 1048512   ;;  %vm110_vm5 = vcmask 982912  }
   0x2   :  { %v863_v1 = vld [vmem:[%s1589_s0 + $0xf] ss:$16 sm:%s46_s7]   ;;  %s91_s18 = smov 3  ;;  %s94_s21 = smov 12  ;;  %vm158_vm6 = vcmask 917312   ;;  %vm206_vm7 = vcmask 851712  }
   0x3   :  { %v49_v2 = vsel %vm6_vm0, %v863_v1, %v862_v0  ;;  %v864_v3 = vld [vmem:[%s1589_s0 + $0xf] ss:$16 sm:%s51_s12]   ;;  %v870_v6 = vld [vmem:[%s1589_s0 + $0xe] ss:$16 sm:%s91_s18]   ;;  %s99_s22 = smov 48  ;;  %s104_s27 = smov 192 }
   0x4   :  { %v865_v4 = vld [vmem:[%s1589_s0 + $0xf] ss:$16 sm:%s56_s13]   ;;  %v54_v5 = vsel %vm10_vm1, %v864_v3, %v49_v2  ;;  %v871_v8 = vld [vmem:[%s1589_s0 + $0xe] ss:$16 sm:%s94_s21]   ;;  %s1012_s28 = smov 120   ;;  %s66_s2 = smov 3 }
   0x5   :  { %v59_v7 = vsel %vm14_vm2, %v865_v4, %v54_v5  ;;  %v872_v9 = vld [vmem:[%s1589_s0 + $0xe] ss:$16 sm:%s99_s22]   ;;  %v97_v10 = vsel %vm6_vm0, %v871_v8, %v870_v6  ;;  %s69_s3 = smov 12  ;;  %v866_v13 = vld [vmem:[%s1589_s0 + $0x8f] ss:$16 sm:%s66_s2]   ;;  %s74_s8 = smov 48 }
   0x6   :  { %60 = vrot.lane.b32.xlu0 %v59_v7, %s1012_s28  ;;  %v873_v11 = vld [vmem:[%s1589_s0 + $0xe] ss:$16 sm:%s104_s27]   ;;  %v102_v12 = vsel %vm10_vm1, %v872_v9, %v97_v10  ;;  %s79_s9 = smov 192  ;;  %s114_s14 = smov 3  ;;  %vm254_vm8 = vcmask 786112   ;;  %vm302_vm9 = vcmask 720512  }
   0x7   :  { %v867_v14 = vld [vmem:[%s1589_s0 + $0x8f] ss:$16 sm:%s69_s3]   ;;  %v107_v15 = vsel %vm14_vm2, %v873_v11, %v102_v12  ;;  %s117_s15 = smov 12  ;;  %s1013_s16 = smov 112   ;;  %v874_v20 = vld [vmem:[%s1589_s0 + $0x8e] ss:$16 sm:%s114_s14]  }
   0x8   :  { %v72_v16 = vsel %vm6_vm0, %v867_v14, %v866_v13  ;;  %v868_v17 = vld [vmem:[%s1589_s0 + $0x8f] ss:$16 sm:%s74_s8]   ;;  %108 = vrot.lane.b32.xlu1 %v107_v15, %s1013_s16  ;;  %s122_s19 = smov 48  ;;  %s127_s20 = smov 192  ;;  %vm350_vm10 = vcmask 654912   ;;  %vm398_vm11 = vcmask 589312  }
   0x9   :  { %v869_v18 = vld [vmem:[%s1589_s0 + $0x8f] ss:$16 sm:%s79_s9]   ;;  %v77_v19 = vsel %vm10_vm1, %v868_v17, %v72_v16  ;;  %v875_v21 = vld [vmem:[%s1589_s0 + $0x8e] ss:$16 sm:%s117_s15]   ;;  %s187_s25 = smov 3  ;;  %s190_s26 = smov 12 }
   0xa   :  { %v876_v22 = vld [vmem:[%s1589_s0 + $0x8e] ss:$16 sm:%s122_s19]   ;;  %v82_v23 = vsel %vm14_vm2, %v869_v18, %v77_v19  ;;  %v120_v24 = vsel %vm6_vm0, %v875_v21, %v874_v20  ;;  %v886_v26 = vld [vmem:[%s1589_s0 + $0xc] ss:$16 sm:%s187_s25]   ;;  %s195_s3 = smov 48  ;;  %s200_s6 = smov 192 }
   0xb   :  { %v877_v25 = vld [vmem:[%s1589_s0 + $0x8e] ss:$16 sm:%s127_s20]   ;;  %v125_v27 = vsel %vm10_vm1, %v876_v22, %v120_v24  ;;  %v887_v28 = vld [vmem:[%s1589_s0 + $0xc] ss:$16 sm:%s190_s26]   ;;  %s210_s7 = smov 3  ;;  %s213_s12 = smov 12 }
   0xc   :  { %v193_v29 = vsel %vm6_vm0, %v887_v28, %v886_v26  ;;  %v888_v30 = vld [vmem:[%s1589_s0 + $0xc] ss:$16 sm:%s195_s3]   ;;  %s218_s13 = smov 48  ;;  %v130_v32 = vsel %vm14_vm2, %v877_v25, %v125_v27  ;;  %s223_s15 = smov 192  ;;  %vm446_vm12 = vcmask 523712   ;;  %vm494_vm13 = vcmask 458112  }
   0xd   :  { %v890_v31 = vld [vmem:[%s1589_s0 + $0x8c] ss:$16 sm:%s210_s7]   ;;  %s258_s17 = smov 3  ;;  %s261_s18 = smov 12  ;;  %v198_v34 = vsel %vm10_vm1, %v888_v30, %v193_v29  ;;  %vm542_vm14 = vcmask 392512   ;;  %vm590_vm15 = vcmask 326912  }
   0xe   :  { %83 = vrot.lane.b32.xlu0 %v82_v23, %s1012_s28  ;;  %v891_v33 = vld [vmem:[%s1589_s0 + $0x8c] ss:$16 sm:%s213_s12]   ;;  %s266_s23 = smov 48  ;;  %s139_s27 = smov 3 }
   0xf   :  { %v889_v35 = vld [vmem:[%s1589_s0 + $0xc] ss:$16 sm:%s200_s6]   ;;  %v216_v36 = vsel %vm6_vm0, %v891_v33, %v890_v31  ;;  %v898_v39 = vld [vmem:[%s1589_s0 + $0x8b] ss:$16 sm:%s258_s17]   ;;  %s142_s29 = smov 12  ;;  %s147_s5 = smov 48 }
  0x10   :  { %v892_v37 = vld [vmem:[%s1589_s0 + $0x8c] ss:$16 sm:%s218_s13]   ;;  %131 = vrot.lane.b32.xlu1 %v130_v32, %s1013_s16  ;;  %s152_s6 = smov 192  ;;  %v203_v42 = vsel %vm14_vm2, %v889_v35, %v198_v34  ;;  %s271_s7 = smov 192 }
  0x11   :  { %v893_v38 = vld [vmem:[%s1589_s0 + $0x8c] ss:$16 sm:%s223_s15]   ;;  %v899_v40 = vld [vmem:[%s1589_s0 + $0x8b] ss:$16 sm:%s261_s18]   ;;  %v221_v43 = vsel %vm10_vm1, %v892_v37, %v216_v36  ;;  %s283_s12 = smov 3  ;;  %s286_s17 = smov 12 }
  0x12   :  { %v878_v41 = vld [vmem:[%s1589_s0 + $0xd] ss:$16 sm:%s139_s27]   ;;  %v900_v46 = vld [vmem:[%s1589_s0 + $0x8b] ss:$16 sm:%s266_s23]   ;;  %v264_v49 = vsel %vm6_vm0, %v899_v40, %v898_v39  ;;  %s291_s22 = smov 48  ;;  %s296_s23 = smov 192  ;;  %v226_v53 = vsel %vm14_vm2, %v893_v38, %v221_v43 }
  0x13   :  { %v879_v44 = vld [vmem:[%s1589_s0 + $0xd] ss:$16 sm:%s142_s29]   ;;  %v902_v51 = vld [vmem:[%s1589_s0 + $0xa] ss:$16 sm:%s283_s12]   ;;  %s1014_s16 = smov 96   ;;  %s331_s24 = smov 3  ;;  %v269_v56 = vsel %vm10_vm1, %v900_v46, %v264_v49 }
  0x14   :  { %v880_v45 = vld [vmem:[%s1589_s0 + $0xd] ss:$16 sm:%s147_s5]   ;;  %v145_v47 = vsel %vm6_vm0, %v879_v44, %v878_v41  ;;  %v903_v52 = vld [vmem:[%s1589_s0 + $0xa] ss:$16 sm:%s286_s17]   ;;  %s334_s25 = smov 12  ;;  %s1015_s29 = smov 104  }
  0x15   :  { %v881_v48 = vld [vmem:[%s1589_s0 + $0xd] ss:$16 sm:%s152_s6]   ;;  %v150_v50 = vsel %vm10_vm1, %v880_v45, %v145_v47  ;;  %v901_v55 = vld [vmem:[%s1589_s0 + $0x8b] ss:$16 sm:%s271_s7]   ;;  %v289_v57 = vsel %vm6_vm0, %v903_v52, %v902_v51  ;;  %s339_s5 = smov 48  ;;  %s162_s6 = smov 3 }
  0x16   :  { %204 = vrot.lane.b32.xlu0 %v203_v42, %s1014_s16  ;;  %v155_v54 = vsel %vm14_vm2, %v881_v48, %v150_v50  ;;  %v904_v58 = vld [vmem:[%s1589_s0 + $0xa] ss:$16 sm:%s291_s22]   ;;  %s165_s11 = smov 12  ;;  %s170_s12 = smov 48  ;;  %v274_v0 = vsel %vm14_vm2, %v901_v55, %v269_v56 }
  0x17   :  { %156 = vrot.lane.b32.xlu2 %v155_v54, %s1015_s29  ;;  %v910_v59 = vld [vmem:[%s1589_s0 + $0x9] ss:$16 sm:%s331_s24]   ;;  %s175_s17 = smov 192  ;;  %s354_s18 = smov 3  ;;  %v294_v1 = vsel %vm10_vm1, %v904_v58, %v289_v57 }
  0x18   :  { %227 = vrot.lane.b32.xlu1 %v226_v53, %s1014_s16  ;;  %v905_v60 = vld [vmem:[%s1589_s0 + $0xa] ss:$16 sm:%s296_s23]   ;;  %s344_s19 = smov 192  ;;  %s357_s16 = smov 12 }
  0x19   :  { %v911_v61 = vld [vmem:[%s1589_s0 + $0x9] ss:$16 sm:%s334_s25]   ;;  %v882_v62 = vld [vmem:[%s1589_s0 + $0x8d] ss:$16 sm:%s162_s6]   ;;  %s362_s26 = smov 48  ;;  %s402_s4 = smov 3  ;;  %v299_v11 = vsel %vm14_vm2, %v905_v60, %v294_v1 }
  0x1a   :  { %v883_v63 = vld [vmem:[%s1589_s0 + $0x8d] ss:$16 sm:%s165_s11]   ;;  %v912_v5 = vld [vmem:[%s1589_s0 + $0x9] ss:$16 sm:%s339_s5]   ;;  %v337_v7 = vsel %vm6_vm0, %v911_v61, %v910_v59  ;;  %s405_s5 = smov 12  ;;  %s1016_s6 = smov 88  }
  0x1b   :  { %v168_v2 = vsel %vm6_vm0, %v883_v63, %v882_v62  ;;  %v884_v3 = vld [vmem:[%s1589_s0 + $0x8d] ss:$16 sm:%s170_s12]   ;;  %v914_v9 = vld [vmem:[%s1589_s0 + $0x89] ss:$16 sm:%s354_s18]   ;;  %s367_s9 = smov 192  ;;  %s235_s11 = smov 3  ;;  %v342_v14 = vsel %vm10_vm1, %v912_v5, %v337_v7 }
  0x1c   :  { %v885_v4 = vld [vmem:[%s1589_s0 + $0x8d] ss:$16 sm:%s175_s17]   ;;  %v173_v6 = vsel %vm10_vm1, %v884_v3, %v168_v2  ;;  %v915_v10 = vld [vmem:[%s1589_s0 + $0x89] ss:$16 sm:%s357_s16]   ;;  %s238_s12 = smov 12  ;;  %s243_s17 = smov 48 }
  0x1d   :  { %v178_v8 = vsel %vm14_vm2, %v885_v4, %v173_v6  ;;  %v913_v12 = vld [vmem:[%s1589_s0 + $0x9] ss:$16 sm:%s344_s19]   ;;  %v360_v15 = vsel %vm6_vm0, %v915_v10, %v914_v9  ;;  %v922_v16 = vld [vmem:[%s1589_s0 + $0x88] ss:$16 sm:%s402_s4]   ;;  %s248_s18 = smov 192  ;;  %s1017_s19 = smov 80  }
  0x1e   :  { %275 = vrot.lane.b32.xlu0 %v274_v0, %s1016_s6  ;;  %v916_v13 = vld [vmem:[%s1589_s0 + $0x89] ss:$16 sm:%s362_s26]   ;;  %s410_s20 = smov 48  ;;  %s427_s26 = smov 3  ;;  %v347_v21 = vsel %vm14_vm2, %v913_v12, %v342_v14 }
  0x1f   :  { %179 = vrot.lane.b32.xlu2 %v178_v8, %s1015_s29  ;;  %v923_v17 = vld [vmem:[%s1589_s0 + $0x88] ss:$16 sm:%s405_s5]   ;;  %s430_s27 = smov 12  ;;  %v365_v22 = vsel %vm10_vm1, %v916_v13, %v360_v15  ;;  %s415_s3 = smov 192 }
  0x20   :  { %300 = vrot.lane.b32.xlu1 %v299_v11, %s1017_s19  ;;  %v894_v18 = vld [vmem:[%s1589_s0 + $0xb] ss:$16 sm:%s235_s11]   ;;  %v408_v28 = vsel %vm6_vm0, %v923_v17, %v922_v16  ;;  %s475_s13 = smov 3  ;;  %s478_s28 = smov 12 }
  0x21   :  { %v895_v19 = vld [vmem:[%s1589_s0 + $0xb] ss:$16 sm:%s238_s12]   ;;  %v917_v23 = vld [vmem:[%s1589_s0 + $0x89] ss:$16 sm:%s367_s9]   ;;  %s435_s9 = smov 48  ;;  %s1018_s14 = smov 72  }
  0x22   :  { %v896_v20 = vld [vmem:[%s1589_s0 + $0xb] ss:$16 sm:%s243_s17]   ;;  %v241_v24 = vsel %vm6_vm0, %v895_v19, %v894_v18  ;;  %v924_v26 = vld [vmem:[%s1589_s0 + $0x88] ss:$16 sm:%s410_s20]   ;;  %v370_v32 = vsel %vm14_vm2, %v917_v23, %v365_v22  ;;  %s309_s20 = smov 12  ;;  %s314_s22 = smov 48 }
  0x23   :  { %v897_v25 = vld [vmem:[%s1589_s0 + $0xb] ss:$16 sm:%s248_s18]   ;;  %v246_v27 = vsel %vm10_vm1, %v896_v20, %v241_v24  ;;  %v926_v30 = vld [vmem:[%s1589_s0 + $0x7] ss:$16 sm:%s427_s26]   ;;  %s306_s18 = smov 3  ;;  %s319_s23 = smov 192  ;;  %v413_v35 = vsel %vm10_vm1, %v924_v26, %v408_v28 }
  0x24   :  { %v251_v29 = vsel %vm14_vm2, %v897_v25, %v246_v27  ;;  %v927_v31 = vld [vmem:[%s1589_s0 + $0x7] ss:$16 sm:%s430_s27]   ;;  %v925_v33 = vld [vmem:[%s1589_s0 + $0x88] ss:$16 sm:%s415_s3]   ;;  %s440_s16 = smov 192  ;;  %s483_s3 = smov 48 }
  0x25   :  { %v928_v34 = vld [vmem:[%s1589_s0 + $0x7] ss:$16 sm:%s435_s9]   ;;  %v433_v36 = vsel %vm6_vm0, %v927_v31, %v926_v30  ;;  %v934_v37 = vld [vmem:[%s1589_s0 + $0x6] ss:$16 sm:%s475_s13]   ;;  %s498_s10 = smov 3  ;;  %s501_s11 = smov 12  ;;  %v418_v44 = vsel %vm14_vm2, %v925_v33, %v413_v35 }
  0x26   :  { %348 = vrot.lane.b32.xlu0 %v347_v21, %s1018_s14  ;;  %v935_v38 = vld [vmem:[%s1589_s0 + $0x6] ss:$16 sm:%s478_s28]   ;;  %v438_v45 = vsel %vm10_vm1, %v928_v34, %v433_v36  ;;  %s488_s28 = smov 192  ;;  %s506_s17 = smov 48 }
  0x27   :  { %252 = vrot.lane.b32.xlu2 %v251_v29, %s1016_s6  ;;  %v906_v39 = vld [vmem:[%s1589_s0 + $0x8a] ss:$16 sm:%s306_s18]   ;;  %s546_s18 = smov 3  ;;  %v481_v50 = vsel %vm6_vm0, %v935_v38, %v934_v37  ;;  %s1019_s24 = smov 64  }
  0x28   :  { %371 = vrot.lane.b32.xlu1 %v370_v32, %s1018_s14  ;;  %v907_v40 = vld [vmem:[%s1589_s0 + $0x8a] ss:$16 sm:%s309_s20]   ;;  %s387_s27 = smov 48  ;;  %s549_s2 = smov 12 }
  0x29   :  { %v312_v41 = vsel %vm6_vm0, %v907_v40, %v906_v39  ;;  %v908_v42 = vld [vmem:[%s1589_s0 + $0x8a] ss:$16 sm:%s314_s22]   ;;  %v929_v46 = vld [vmem:[%s1589_s0 + $0x7] ss:$16 sm:%s440_s16]   ;;  %s382_s16 = smov 12  ;;  %s511_s4 = smov 192 }
  0x2a   :  { %v909_v43 = vld [vmem:[%s1589_s0 + $0x8a] ss:$16 sm:%s319_s23]   ;;  %v317_v47 = vsel %vm10_vm1, %v908_v42, %v312_v41  ;;  %v936_v48 = vld [vmem:[%s1589_s0 + $0x6] ss:$16 sm:%s483_s3]   ;;  %s379_s23 = smov 3  ;;  %v443_v53 = vsel %vm14_vm2, %v929_v46, %v438_v45  ;;  %s392_s3 = smov 192 }
  0x2b   :  { %v322_v49 = vsel %vm14_vm2, %v909_v43, %v317_v47  ;;  %v938_v51 = vld [vmem:[%s1589_s0 + $0x86] ss:$16 sm:%s498_s10]   ;;  %v486_v56 = vsel %vm10_vm1, %v936_v48, %v481_v50  ;;  %v946_v58 = vld [vmem:[%s1589_s0 + $0x85] ss:$16 sm:%s546_s18]   ;;  %s554_s12 = smov 48  ;;  %s571_s20 = smov 3 }
  0x2c   :  { %v939_v52 = vld [vmem:[%s1589_s0 + $0x86] ss:$16 sm:%s501_s11]   ;;  %v918_v59 = vld [vmem:[%s1589_s0 + $0x8] ss:$16 sm:%s379_s23]   ;;  %s1020_s11 = smov 56   ;;  %s574_s6 = smov 12 }
  0x2d   :  { %v937_v54 = vld [vmem:[%s1589_s0 + $0x6] ss:$16 sm:%s488_s28]   ;;  %v504_v57 = vsel %vm6_vm0, %v939_v52, %v938_v51  ;;  %v919_v60 = vld [vmem:[%s1589_s0 + $0x8] ss:$16 sm:%s382_s16]   ;;  %s559_s23 = smov 192  ;;  %s579_s16 = smov 48 }
  0x2e   :  { %419 = vrot.lane.b32.xlu0 %v418_v44, %s1019_s24  ;;  %v940_v55 = vld [vmem:[%s1589_s0 + $0x86] ss:$16 sm:%s506_s17]   ;;  %v385_v61 = vsel %vm6_vm0, %v919_v60, %v918_v59  ;;  %v491_v2 = vsel %vm14_vm2, %v937_v54, %v486_v56  ;;  %s458_s5 = smov 48  ;;  %s1021_s7 = smov 48  }
  0x2f   :  { %323 = vrot.lane.b32.xlu2 %v322_v49, %s1017_s19  ;;  %v920_v62 = vld [vmem:[%s1589_s0 + $0x8] ss:$16 sm:%s387_s27]   ;;  %v509_v3 = vsel %vm10_vm1, %v940_v55, %v504_v57  ;;  %s450_s27 = smov 3  ;;  %s622_s13 = smov 12 }
  0x30   :  { %444 = vrot.lane.b32.xlu1 %v443_v53, %s1020_s11  ;;  %v947_v63 = vld [vmem:[%s1589_s0 + $0x85] ss:$16 sm:%s549_s2]   ;;  %v390_v0 = vsel %vm10_vm1, %v920_v62, %v385_v61  ;;  %s584_s15 = smov 192  ;;  %s627_s21 = smov 48 }
  0x31   :  { %v921_v1 = vld [vmem:[%s1589_s0 + $0x8] ss:$16 sm:%s392_s3]   ;;  %v941_v4 = vld [vmem:[%s1589_s0 + $0x86] ss:$16 sm:%s511_s4]   ;;  %v552_v7 = vsel %vm6_vm0, %v947_v63, %v946_v58  ;;  %s453_s4 = smov 12  ;;  %s642_s19 = smov 3 }
  0x32   :  { %v948_v5 = vld [vmem:[%s1589_s0 + $0x85] ss:$16 sm:%s554_s12]   ;;  %v395_v6 = vsel %vm14_vm2, %v921_v1, %v390_v0  ;;  %v950_v8 = vld [vmem:[%s1589_s0 + $0x4] ss:$16 sm:%s571_s20]   ;;  %v514_v10 = vsel %vm14_vm2, %v941_v4, %v509_v3  ;;  %s463_s12 = smov 192  ;;  %s645_s30 = smov 12 }
  0x33   :  { %v951_v9 = vld [vmem:[%s1589_s0 + $0x4] ss:$16 sm:%s574_s6]   ;;  %v949_v11 = vld [vmem:[%s1589_s0 + $0x85] ss:$16 sm:%s559_s23]   ;;  %v557_v14 = vsel %vm10_vm1, %v948_v5, %v552_v7  ;;  %s526_s9 = smov 12  ;;  %s531_s28 = smov 48 }
  0x34   :  { %v952_v12 = vld [vmem:[%s1589_s0 + $0x4] ss:$16 sm:%s579_s16]   ;;  %v930_v13 = vld [vmem:[%s1589_s0 + $0x87] ss:$16 sm:%s450_s27]   ;;  %v577_v15 = vsel %vm6_vm0, %v951_v9, %v950_v8  ;;  %v562_v23 = vsel %vm14_vm2, %v949_v11, %v557_v14  ;;  %s1022_s14 = smov 40   ;;  %s536_s6 = smov 192 }
  0x35   :  { %v931_v16 = vld [vmem:[%s1589_s0 + $0x87] ss:$16 sm:%s453_s4]   ;;  %v959_v21 = vld [vmem:[%s1589_s0 + $0x3] ss:$16 sm:%s622_s13]   ;;  %v582_v24 = vsel %vm10_vm1, %v952_v12, %v577_v15  ;;  %s632_s4 = smov 192  ;;  %s650_s13 = smov 48 }
  0x36   :  { %492 = vrot.lane.b32.xlu0 %v491_v2, %s1021_s7  ;;  %v932_v17 = vld [vmem:[%s1589_s0 + $0x87] ss:$16 sm:%s458_s5]   ;;  %v456_v18 = vsel %vm6_vm0, %v931_v16, %v930_v13  ;;  %s523_s5 = smov 3  ;;  %s655_s26 = smov 192 }
  0x37   :  { %396 = vrot.lane.b32.xlu2 %v395_v6, %s1019_s24  ;;  %s619_s24 = smov 3  ;;  %v933_v19 = vld [vmem:[%s1589_s0 + $0x87] ss:$16 sm:%s463_s12]   ;;  %v461_v22 = vsel %vm10_vm1, %v932_v17, %v456_v18  ;;  %s1023_s2 = smov 32  }
  0x38   :  { %515 = vrot.lane.b32.xlu1 %v514_v10, %s1021_s7  ;;  %v958_v20 = vld [vmem:[%s1589_s0 + $0x3] ss:$16 sm:%s619_s24]   ;;  %v466_v27 = vsel %vm14_vm2, %v933_v19, %v461_v22  ;;  %s698_s3 = smov 48  ;;  %s597_s7 = smov 12 }
  0x39   :  { %v953_v25 = vld [vmem:[%s1589_s0 + $0x4] ss:$16 sm:%s584_s15]   ;;  %v960_v26 = vld [vmem:[%s1589_s0 + $0x3] ss:$16 sm:%s627_s21]   ;;  %v625_v28 = vsel %vm6_vm0, %v959_v21, %v958_v20  ;;  %s693_s21 = smov 12  ;;  %s715_s12 = smov 3 }
  0x3a   :  { %v962_v29 = vld [vmem:[%s1589_s0 + $0x83] ss:$16 sm:%s642_s19]   ;;  %v587_v31 = vsel %vm14_vm2, %v953_v25, %v582_v24  ;;  %v942_v33 = vld [vmem:[%s1589_s0 + $0x5] ss:$16 sm:%s523_s5]   ;;  %v630_v35 = vsel %vm10_vm1, %v960_v26, %v625_v28  ;;  %s718_s24 = smov 12  ;;  %s602_s18 = smov 48 }
  0x3b   :  { %v963_v30 = vld [vmem:[%s1589_s0 + $0x83] ss:$16 sm:%s645_s30]   ;;  %v943_v34 = vld [vmem:[%s1589_s0 + $0x5] ss:$16 sm:%s526_s9]   ;;  %s594_s30 = smov 3  ;;  %s703_s22 = smov 192 }
  0x3c   :  { %v961_v32 = vld [vmem:[%s1589_s0 + $0x3] ss:$16 sm:%s632_s4]   ;;  %v648_v36 = vsel %vm6_vm0, %v963_v30, %v962_v29  ;;  %v529_v38 = vsel %vm6_vm0, %v943_v34, %v942_v33  ;;  %v944_v39 = vld [vmem:[%s1589_s0 + $0x5] ss:$16 sm:%s531_s28]   ;;  %s723_s27 = smov 48  ;;  %s1024_s19 = smov 24  }
  0x3d   :  { %v964_v37 = vld [vmem:[%s1589_s0 + $0x83] ss:$16 sm:%s650_s13]   ;;  %v534_v40 = vsel %vm10_vm1, %v944_v39, %v529_v38  ;;  %v945_v41 = vld [vmem:[%s1589_s0 + $0x5] ss:$16 sm:%s536_s6]   ;;  %v635_v44 = vsel %vm14_vm2, %v961_v32, %v630_v35  ;;  %s607_s4 = smov 192  ;;  %s667_s29 = smov 3 }
  0x3e   :  { %563 = vrot.lane.b32.xlu0 %v562_v23, %s1022_s14  ;;  %v971_v43 = vld [vmem:[%s1589_s0 + $0x82] ss:$16 sm:%s693_s21]   ;;  %v653_v45 = vsel %vm10_vm1, %v964_v37, %v648_v36  ;;  %v539_v49 = vsel %vm14_vm2, %v945_v41, %v534_v40  ;;  %s670_s10 = smov 12  ;;  %s675_s6 = smov 48 }
  0x3f   :  { %467 = vrot.lane.b32.xlu2 %v466_v27, %s1020_s11  ;;  %s690_s11 = smov 3  ;;  %v965_v46 = vld [vmem:[%s1589_s0 + $0x83] ss:$16 sm:%s655_s26]   ;;  %s680_s23 = smov 192 }
  0x40   :  { %588 = vrot.lane.b32.xlu1 %v587_v31, %s1023_s2  ;;  %v970_v42 = vld [vmem:[%s1589_s0 + $0x82] ss:$16 sm:%s690_s11]   ;;  %v658_v54 = vsel %vm14_vm2, %v965_v46, %v653_v45  ;;  %s1025_s11 = smov 16   ;;  %s741_s16 = smov 12 }
  0x41   :  { %v954_v47 = vld [vmem:[%s1589_s0 + $0x84] ss:$16 sm:%s594_s30]   ;;  %v972_v48 = vld [vmem:[%s1589_s0 + $0x82] ss:$16 sm:%s698_s3]   ;;  %v696_v51 = vsel %vm6_vm0, %v971_v43, %v970_v42  ;;  %s1026_s25 = smov 8   ;;  %s8_s30 = smov 48 }
  0x42   :  { %v955_v50 = vld [vmem:[%s1589_s0 + $0x84] ss:$16 sm:%s597_s7]   ;;  %v974_v52 = vld [vmem:[%s1589_s0 + $0x1] ss:$16 sm:%s715_s12]   ;;  %v701_v57 = vsel %vm10_vm1, %v972_v48, %v696_v51  ;;  %s12_s3 = smov 192  ;;  %s2_s8 = smov 3 }
  0x43   :  { %v975_v53 = vld [vmem:[%s1589_s0 + $0x1] ss:$16 sm:%s718_s24]   ;;  %v600_v55 = vsel %vm6_vm0, %v955_v50, %v954_v47  ;;  %v956_v56 = vld [vmem:[%s1589_s0 + $0x84] ss:$16 sm:%s602_s18]   ;;  %s4_s9 = smov 12  ;;  %s751_s15 = smov 192 }
  0x44   :  { %v973_v58 = vld [vmem:[%s1589_s0 + $0x82] ss:$16 sm:%s703_s22]   ;;  %v721_v59 = vsel %vm6_vm0, %v975_v53, %v974_v52  ;;  %v976_v60 = vld [vmem:[%s1589_s0 + $0x1] ss:$16 sm:%s723_s27]   ;;  %v605_v61 = vsel %vm10_vm1, %v956_v56, %v600_v55  ;;  %s20_s22 = smov 3 }
  0x45   :  { %v957_v62 = vld [vmem:[%s1589_s0 + $0x84] ss:$16 sm:%s607_s4]   ;;  %v706_v0 = vsel %vm14_vm2, %v973_v58, %v701_v57  ;;  %v726_v1 = vsel %vm10_vm1, %v976_v60, %v721_v59  ;;  %v966_v2 = vld [vmem:[%s1589_s0 + $0x2] ss:$16 sm:%s667_s29]  }
  0x46   :  { %636 = vrot.lane.b32.xlu0 %v635_v44, %s1024_s19  ;;  %v967_v3 = vld [vmem:[%s1589_s0 + $0x2] ss:$16 sm:%s670_s10]   ;;  %v610_v4 = vsel %vm14_vm2, %v957_v62, %v605_v61 }
  0x47   :  { %540 = vrot.lane.b32.xlu2 %v539_v49, %s1022_s14  ;;  %s728_s14 = smov 192  ;;  %v673_v6 = vsel %vm6_vm0, %v967_v3, %v966_v2  ;;  %v968_v7 = vld [vmem:[%s1589_s0 + $0x2] ss:$16 sm:%s675_s6]  }
  0x48   :  { %659 = vrot.lane.b32.xlu1 %v658_v54, %s1024_s19  ;;  %v977_v63 = vld [vmem:[%s1589_s0 + $0x1] ss:$16 sm:%s728_s14]   ;;  %v678_v8 = vsel %vm10_vm1, %v968_v7, %v673_v6  ;;  %s746_s19 = smov 48 }
  0x49   :  { %v731_v5 = vsel %vm14_vm2, %v977_v63, %v726_v1  ;;  %v969_v9 = vld [vmem:[%s1589_s0 + $0x2] ss:$16 sm:%s680_s23]   ;;  %v979_v11 = vld [vmem:[%s1589_s0 + $0x81] ss:$16 sm:%s741_s16]   ;;  %s23_s23 = smov 12  ;;  %s33_s16 = smov 192 }
  0x4a   :  { %v683_v12 = vsel %vm14_vm2, %v969_v9, %v678_v8  ;;  %v980_v13 = vld [vmem:[%s1589_s0 + $0x81] ss:$16 sm:%s746_s19]   ;;  %v9_v14 = vld [vmem:[%s1589_s0] ss:$16 sm:%s8_s30]  }
  0x4b   :  { %v13_v15 = vld [vmem:[%s1589_s0] ss:$16 sm:%s12_s3]   ;;  %v981_v22 = vld [vmem:[%s1589_s0 + $0x81] ss:$16 sm:%s751_s15]  }
  0x4c   :  { %v3_v17 = vld [vmem:[%s1589_s0] ss:$16 sm:%s2_s8]  }
  0x4d   :  { %v5_v18 = vld [vmem:[%s1589_s0] ss:$16 sm:%s4_s9]  }
  0x4e   :  { %707 = vrot.lane.b32.xlu0 %v706_v0, %s1025_s11  ;;  %v7_v19 = vsel %vm6_vm0, %v5_v18, %v3_v17  ;;  %v858_v25 = vld [vmem:[%s1589_s0 + $0x80] ss:$16 sm:%s20_s22]  }
  0x4f   :  { %611 = vrot.lane.b32.xlu2 %v610_v4, %s1023_s2  ;;  %s738_s2 = smov 3  ;;  %v11_v20 = vsel %vm10_vm1, %v9_v14, %v7_v19  ;;  %v859_v26 = vld [vmem:[%s1589_s0 + $0x80] ss:$16 sm:%s23_s23]  }
  0x50   :  { %732 = vrot.lane.b32.xlu1 %v731_v5, %s1026_s25  ;;  %v978_v10 = vld [vmem:[%s1589_s0 + $0x81] ss:$16 sm:%s738_s2]   ;;  %v15_v23 = vsel %vm14_vm2, %v13_v15, %v11_v20  ;;  %s28_s2 = smov 48  ;;  %v26_v29 = vsel %vm6_vm0, %v859_v26, %v858_v25 }
  0x51   :  { %v744_v16 = vsel %vm6_vm0, %v979_v11, %v978_v10  ;;  %17 = vst.msk [vmem:[#allocation0] ss:$8 sm:$0xf] %vm16_vm3, %v15_v23   ;;  %v860_v27 = vld [vmem:[%s1589_s0 + $0x80] ss:$16 sm:%s28_s2]   ;;  %vm638_vm0 = vcmask 261312  }
  0x52   :  { %v749_v21 = vsel %vm10_vm1, %v980_v13, %v744_v16  ;;  %18 = vst.msk [vmem:[#allocation0] ss:$8 sm:$0xf0] %vm16_vm3, %v15_v23   ;;  %v861_v28 = vld [vmem:[%s1589_s0 + $0x80] ss:$16 sm:%s33_s16]   ;;  %v31_v30 = vsel %vm10_vm1, %v860_v27, %v26_v29  ;;  %vm686_vm1 = vcmask 195712  }
  0x53   :  { %v754_v24 = vsel %vm14_vm2, %v981_v22, %v749_v21  ;;  %v36_v31 = vsel %vm14_vm2, %v861_v28, %v31_v30  ;;  %vm734_vm2 = vcmask 130112  }
  0x54   :  { %39 = vst.msk [vmem:[#allocation0 + $0x40] ss:$8 sm:$0xf] %vm16_vm3, %v36_v31  }
  0x55   :  { %41 = vst.msk [vmem:[#allocation0 + $0x40] ss:$8 sm:$0xf0] %vm16_vm3, %v36_v31  }
  0x57   :  { %684 = vrot.lane.b32.xlu2 %v683_v12, %s1025_s11 }
  0x5f   :  { %755 = vrot.lane.b32.xlu2 %v754_v24, %s1026_s25 }
  0x71   :  { %v157_v32 = vpop.permute.xlu2 %156  }
  0x78   :  { %v61_v33 = vpop.permute.xlu0 %60  }
  0x79   :  { %63 = vst.msk [vmem:[#allocation0] ss:$8 sm:$0xf] %vm62_vm4, %v61_v33   ;;  %v180_v34 = vpop.permute.xlu2 %179  }
  0x7a   :  { %64 = vst.msk [vmem:[#allocation0] ss:$8 sm:$0xf0] %vm62_vm4, %v61_v33   ;;  %v109_v35 = vpop.permute.xlu1 %108  }
  0x7b   :  { %111 = vst.msk [vmem:[#allocation0] ss:$8 sm:$0xf] %vm110_vm5, %v109_v35  }
  0x7c   :  { %112 = vst.msk [vmem:[#allocation0] ss:$8 sm:$0xf0] %vm110_vm5, %v109_v35  }
  0x7d   :  { %159 = vst.msk [vmem:[#allocation0] ss:$8 sm:$0xf] %vm158_vm6, %v157_v32  }
  0x7e   :  { %160 = vst.msk [vmem:[#allocation0] ss:$8 sm:$0xf0] %vm158_vm6, %v157_v32  }
  0x80   :  { %v84_v36 = vpop.permute.xlu0 %83  }
  0x81   :  { %87 = vst.msk [vmem:[#allocation0 + $0x40] ss:$8 sm:$0xf] %vm62_vm4, %v84_v36   ;;  %v253_v37 = vpop.permute.xlu2 %252  }
  0x82   :  { %89 = vst.msk [vmem:[#allocation0 + $0x40] ss:$8 sm:$0xf0] %vm62_vm4, %v84_v36   ;;  %v132_v38 = vpop.permute.xlu1 %131  }
  0x83   :  { %135 = vst.msk [vmem:[#allocation0 + $0x40] ss:$8 sm:$0xf] %vm110_vm5, %v132_v38  }
  0x84   :  { %137 = vst.msk [vmem:[#allocation0 + $0x40] ss:$8 sm:$0xf0] %vm110_vm5, %v132_v38  }
  0x85   :  { %183 = vst.msk [vmem:[#allocation0 + $0x40] ss:$8 sm:$0xf] %vm158_vm6, %v180_v34  }
  0x86   :  { %185 = vst.msk [vmem:[#allocation0 + $0x40] ss:$8 sm:$0xf0] %vm158_vm6, %v180_v34  }
  0x88   :  { %v205_v39 = vpop.permute.xlu0 %204  }
  0x89   :  { %207 = vst.msk [vmem:[#allocation0] ss:$8 sm:$0xf] %vm206_vm7, %v205_v39   ;;  %v324_v40 = vpop.permute.xlu2 %323  }
  0x8a   :  { %208 = vst.msk [vmem:[#allocation0] ss:$8 sm:$0xf0] %vm206_vm7, %v205_v39   ;;  %v228_v41 = vpop.permute.xlu1 %227  }
  0x8b   :  { %255 = vst.msk [vmem:[#allocation0] ss:$8 sm:$0xf] %vm254_vm8, %v253_v37  }
  0x8c   :  { %256 = vst.msk [vmem:[#allocation0] ss:$8 sm:$0xf0] %vm254_vm8, %v253_v37  }
  0x8d   :  { %231 = vst.msk [vmem:[#allocation0 + $0x40] ss:$8 sm:$0xf] %vm206_vm7, %v228_v41  }
  0x8e   :  { %233 = vst.msk [vmem:[#allocation0 + $0x40] ss:$8 sm:$0xf0] %vm206_vm7, %v228_v41  }
  0x90   :  { %v276_v42 = vpop.permute.xlu0 %275  }
  0x91   :  { %279 = vst.msk [vmem:[#allocation0 + $0x40] ss:$8 sm:$0xf] %vm254_vm8, %v276_v42   ;;  %v397_v43 = vpop.permute.xlu2 %396  }
  0x92   :  { %281 = vst.msk [vmem:[#allocation0 + $0x40] ss:$8 sm:$0xf0] %vm254_vm8, %v276_v42   ;;  %v301_v44 = vpop.permute.xlu1 %300  }
  0x93   :  { %327 = vst.msk [vmem:[#allocation0 + $0x40] ss:$8 sm:$0xf] %vm302_vm9, %v324_v40  }
  0x94   :  { %329 = vst.msk [vmem:[#allocation0 + $0x40] ss:$8 sm:$0xf0] %vm302_vm9, %v324_v40  }
  0x95   :  { %303 = vst.msk [vmem:[#allocation0] ss:$8 sm:$0xf] %vm302_vm9, %v301_v44  }
  0x96   :  { %304 = vst.msk [vmem:[#allocation0] ss:$8 sm:$0xf0] %vm302_vm9, %v301_v44  }
  0x98   :  { %v349_v45 = vpop.permute.xlu0 %348  }
  0x99   :  { %351 = vst.msk [vmem:[#allocation0] ss:$8 sm:$0xf] %vm350_vm10, %v349_v45   ;;  %v468_v46 = vpop.permute.xlu2 %467  }
  0x9a   :  { %352 = vst.msk [vmem:[#allocation0] ss:$8 sm:$0xf0] %vm350_vm10, %v349_v45   ;;  %v372_v47 = vpop.permute.xlu1 %371  }
  0x9b   :  { %399 = vst.msk [vmem:[#allocation0] ss:$8 sm:$0xf] %vm398_vm11, %v397_v43  }
  0x9c   :  { %400 = vst.msk [vmem:[#allocation0] ss:$8 sm:$0xf0] %vm398_vm11, %v397_v43  }
  0x9d   :  { %375 = vst.msk [vmem:[#allocation0 + $0x40] ss:$8 sm:$0xf] %vm350_vm10, %v372_v47  }
  0x9e   :  { %377 = vst.msk [vmem:[#allocation0 + $0x40] ss:$8 sm:$0xf0] %vm350_vm10, %v372_v47  }
  0xa0   :  { %v420_v48 = vpop.permute.xlu0 %419  }
  0xa1   :  { %423 = vst.msk [vmem:[#allocation0 + $0x40] ss:$8 sm:$0xf] %vm398_vm11, %v420_v48   ;;  %v541_v49 = vpop.permute.xlu2 %540  }
  0xa2   :  { %425 = vst.msk [vmem:[#allocation0 + $0x40] ss:$8 sm:$0xf0] %vm398_vm11, %v420_v48   ;;  %v445_v50 = vpop.permute.xlu1 %444  }
  0xa3   :  { %471 = vst.msk [vmem:[#allocation0 + $0x40] ss:$8 sm:$0xf] %vm446_vm12, %v468_v46  }
  0xa4   :  { %473 = vst.msk [vmem:[#allocation0 + $0x40] ss:$8 sm:$0xf0] %vm446_vm12, %v468_v46  }
  0xa5   :  { %447 = vst.msk [vmem:[#allocation0] ss:$8 sm:$0xf] %vm446_vm12, %v445_v50  }
  0xa6   :  { %448 = vst.msk [vmem:[#allocation0] ss:$8 sm:$0xf0] %vm446_vm12, %v445_v50  }
  0xa8   :  { %v493_v51 = vpop.permute.xlu0 %492  }
  0xa9   :  { %495 = vst.msk [vmem:[#allocation0] ss:$8 sm:$0xf] %vm494_vm13, %v493_v51   ;;  %v612_v52 = vpop.permute.xlu2 %611  }
  0xaa   :  { %496 = vst.msk [vmem:[#allocation0] ss:$8 sm:$0xf0] %vm494_vm13, %v493_v51   ;;  %v516_v53 = vpop.permute.xlu1 %515  }
  0xab   :  { %543 = vst.msk [vmem:[#allocation0] ss:$8 sm:$0xf] %vm542_vm14, %v541_v49  }
  0xac   :  { %544 = vst.msk [vmem:[#allocation0] ss:$8 sm:$0xf0] %vm542_vm14, %v541_v49  }
  0xad   :  { %519 = vst.msk [vmem:[#allocation0 + $0x40] ss:$8 sm:$0xf] %vm494_vm13, %v516_v53  }
  0xae   :  { %521 = vst.msk [vmem:[#allocation0 + $0x40] ss:$8 sm:$0xf0] %vm494_vm13, %v516_v53  }
  0xb0   :  { %v564_v54 = vpop.permute.xlu0 %563  }
  0xb1   :  { %567 = vst.msk [vmem:[#allocation0 + $0x40] ss:$8 sm:$0xf] %vm542_vm14, %v564_v54   ;;  %v685_v55 = vpop.permute.xlu2 %684  }
  0xb2   :  { %569 = vst.msk [vmem:[#allocation0 + $0x40] ss:$8 sm:$0xf0] %vm542_vm14, %v564_v54   ;;  %v589_v56 = vpop.permute.xlu1 %588  }
  0xb3   :  { %615 = vst.msk [vmem:[#allocation0 + $0x40] ss:$8 sm:$0xf] %vm590_vm15, %v612_v52  }
  0xb4   :  { %617 = vst.msk [vmem:[#allocation0 + $0x40] ss:$8 sm:$0xf0] %vm590_vm15, %v612_v52  }
  0xb5   :  { %591 = vst.msk [vmem:[#allocation0] ss:$8 sm:$0xf] %vm590_vm15, %v589_v56  }
  0xb6   :  { %592 = vst.msk [vmem:[#allocation0] ss:$8 sm:$0xf0] %vm590_vm15, %v589_v56  }
  0xb8   :  { %v637_v57 = vpop.permute.xlu0 %636  }
  0xb9   :  { %639 = vst.msk [vmem:[#allocation0] ss:$8 sm:$0xf] %vm638_vm0, %v637_v57   ;;  %v756_v58 = vpop.permute.xlu2 %755  }
  0xba   :  { %640 = vst.msk [vmem:[#allocation0] ss:$8 sm:$0xf0] %vm638_vm0, %v637_v57   ;;  %v660_v59 = vpop.permute.xlu1 %659  }
  0xbb   :  { %687 = vst.msk [vmem:[#allocation0] ss:$8 sm:$0xf] %vm686_vm1, %v685_v55  }
  0xbc   :  { %688 = vst.msk [vmem:[#allocation0] ss:$8 sm:$0xf0] %vm686_vm1, %v685_v55  }
  0xbd   :  { %663 = vst.msk [vmem:[#allocation0 + $0x40] ss:$8 sm:$0xf] %vm638_vm0, %v660_v59  }
  0xbe   :  { %665 = vst.msk [vmem:[#allocation0 + $0x40] ss:$8 sm:$0xf0] %vm638_vm0, %v660_v59  }
  0xc0   :  { %v708_v60 = vpop.permute.xlu0 %707  }
  0xc1   :  { %711 = vst.msk [vmem:[#allocation0 + $0x40] ss:$8 sm:$0xf] %vm686_vm1, %v708_v60  }
  0xc2   :  { %713 = vst.msk [vmem:[#allocation0 + $0x40] ss:$8 sm:$0xf0] %vm686_vm1, %v708_v60   ;;  %v733_v61 = vpop.permute.xlu1 %732  }
  0xc3   :  { %759 = vst.msk [vmem:[#allocation0 + $0x40] ss:$8 sm:$0xf] %vm734_vm2, %v756_v58  }
  0xc4   :  { %761 = vst.msk [vmem:[#allocation0 + $0x40] ss:$8 sm:$0xf0] %vm734_vm2, %v756_v58  }
  0xc5   :  { %735 = vst.msk [vmem:[#allocation0] ss:$8 sm:$0xf] %vm734_vm2, %v733_v61  }
  0xc6   :  { %736 = vst.msk [vmem:[#allocation0] ss:$8 sm:$0xf0] %vm734_vm2, %v733_v61  }
  0xca   :  { %v811_v62 = vld [vmem:[#allocation0 + $0x40] sm:$0x1]  ;;  %v817_v63 = vld [vmem:[#allocation0 + $0x48] sm:$0x1]  ;;  %v823_v0 = vld [vmem:[#allocation0 + $0x50] sm:$0x1] }
  0xcb   :  { %989 = vst [vmem:[%s1590_s1 + $0x8] sm:$0x1] %v811_v62  ;;  %v829_v1 = vld [vmem:[#allocation0 + $0x58] sm:$0x1]  ;;  %v835_v2 = vld [vmem:[#allocation0 + $0x60] sm:$0x1] }
  0xcc   :  { %990 = vst [vmem:[%s1590_s1 + $0x9] sm:$0x1] %v817_v63  ;;  %v841_v3 = vld [vmem:[#allocation0 + $0x68] sm:$0x1]  ;;  %v847_v4 = vld [vmem:[#allocation0 + $0x70] sm:$0x1] }
  0xcd   :  { %991 = vst [vmem:[%s1590_s1 + $0xa] sm:$0x1] %v823_v0  ;;  %v853_v5 = vld [vmem:[#allocation0 + $0x78] sm:$0x1]  ;;  %v764_v6 = vld [vmem:[#allocation0] sm:$0x1] }
  0xce   :  { %992 = vst [vmem:[%s1590_s1 + $0xb] sm:$0x1] %v829_v1  ;;  %v769_v7 = vld [vmem:[#allocation0 + $0x8] sm:$0x1]  ;;  %v775_v8 = vld [vmem:[#allocation0 + $0x10] sm:$0x1] }
  0xcf   :  { %993 = vst [vmem:[%s1590_s1 + $0xc] sm:$0x1] %v835_v2  ;;  %v781_v9 = vld [vmem:[#allocation0 + $0x18] sm:$0x1]  ;;  %v787_v10 = vld [vmem:[#allocation0 + $0x20] sm:$0x1] }
  0xd0   :  { %994 = vst [vmem:[%s1590_s1 + $0xd] sm:$0x1] %v841_v3  ;;  %v793_v11 = vld [vmem:[#allocation0 + $0x28] sm:$0x1]  ;;  %v799_v12 = vld [vmem:[#allocation0 + $0x30] sm:$0x1] }
  0xd1   :  { %995 = vst [vmem:[%s1590_s1 + $0xe] sm:$0x1] %v847_v4  ;;  %v805_v13 = vld [vmem:[#allocation0 + $0x38] sm:$0x1] }
  0xd2   :  { %996 = vst [vmem:[%s1590_s1 + $0xf] sm:$0x1] %v853_v5 }
  0xd3   :  { %767 = vst [vmem:[%s1590_s1] sm:$0x1] %v764_v6 }
  0xd4   :  { %982 = vst [vmem:[%s1590_s1 + $0x1] sm:$0x1] %v769_v7 }
  0xd5   :  { %983 = vst [vmem:[%s1590_s1 + $0x2] sm:$0x1] %v775_v8 }
  0xd6   :  { %984 = vst [vmem:[%s1590_s1 + $0x3] sm:$0x1] %v781_v9 }
  0xd7   :  { %985 = vst [vmem:[%s1590_s1 + $0x4] sm:$0x1] %v787_v10 }
  0xd8   :  { %986 = vst [vmem:[%s1590_s1 + $0x5] sm:$0x1] %v793_v11 }
  0xd9   :  { %987 = vst [vmem:[%s1590_s1 + $0x6] sm:$0x1] %v799_v12 }
  0xda   :  { %988 = vst [vmem:[%s1590_s1 + $0x7] sm:$0x1] %v805_v13 }

// kernel: unet_up_forward.2
= control target key start
LH: loop header
LB: loop body
LE: loop exit
PB: predicated region body
PF: predicated region fallthrough
CT: control target
= control target key end

     0   :  { %vm371_vm0 = vcmask 1043456   ;;  %vm274_vm1 = vcmask 588800   ;;  %vm608_vm2 = vcmask 257024   ;;  %vm673_vm3 = vcmask 261120   ;;  %s2177_s1 = inlined_call_operand.vmem [shape: bf16[72,32], index: 1, kind: input, shape index: {}]   ;;  %s2178_s0 = inlined_call_operand.vmem [shape: bf16[512,72], index: 0, kind: input, shape index: {}]   ;;  %s2179_s2 = inlined_call_operand.vmem [shape: bf16[512,32], index: 2, kind: output, shape index: {0}]   ;;  %s2180_s3 = inlined_call_operand.vmem [shape: f32[1,2,32], index: 3, kind: output, shape index: {1}]  }
   0x1   :  { %v86_v0 = vld [vmem:[%s2177_s1 + $0x20] sm:$0xf]  ;;  %v1227_v4 = vld [vmem:[%s2177_s1 + $0x18] sm:$0xff]  ;;  %v1226_v5 = vld [vmem:[%s2177_s1 + $0x10] sm:$0xff]  ;;  %vm1004_vm4 = vcmask 1040384   ;;  %vm1006_vm5 = vcmask 254976  }
   0x2   :  { %v264_v1 = vunpack.c.l.b16 %v86_v0  ;;  %v1225_v6 = vld [vmem:[%s2177_s1 + $0x8] sm:$0xff]  ;;  %v1224_v7 = vld [vmem:[%s2177_s1] sm:$0xff]  ;;  %v1194_v13 = vld [vmem:[%s2178_s0 + $0x10] sm:$0xff] }
   0x3   :  { %v1192_v8 = vld [vmem:[%s2178_s0] sm:$0xff]  ;;  %v1193_v10 = vld [vmem:[%s2178_s0 + $0x8] sm:$0xff]  ;;  %v1202_v14 = vld [vmem:[%s2178_s0 + $0x50] sm:$0xff] }
   0x4   :  { %v269_v2 = vpack.c.b16 %v264_v1, %v264_v1  ;;  %v1200_v9 = vld [vmem:[%s2178_s0 + $0x40] sm:$0xff]  ;;  %v1201_v11 = vld [vmem:[%s2178_s0 + $0x48] sm:$0xff]  ;;  %v1195_v16 = vld [vmem:[%s2178_s0 + $0x18] sm:$0xff] }
   0x5   :  { %v1208_v12 = vld [vmem:[%s2178_s0 + $0x80] sm:$0xff]  ;;  %v1209_v15 = vld [vmem:[%s2178_s0 + $0x88] sm:$0xff]  ;;  %v1203_v17 = vld [vmem:[%s2178_s0 + $0x58] sm:$0xff] }
   0x6   :  { %v373_v3 = vsel %vm371_vm0, %v269_v2, 0  ;;  %v1210_v18 = vld [vmem:[%s2178_s0 + $0x90] sm:$0xff]  ;;  %v1216_v19 = vld [vmem:[%s2178_s0 + $0xc0] sm:$0xff]  ;;  %v1211_v22 = vld [vmem:[%s2178_s0 + $0x98] sm:$0xff] }
   0x7   :  { %378 = vmatpush.bf16.msra.mxu0 %v373_v3  ;;  %1228 = vmatpush.bf16.msra.mxu1 %v373_v3  ;;  %v1196_v20 = vld [vmem:[%s2178_s0 + $0x20] sm:$0xff]  ;;  %v1217_v23 = vld [vmem:[%s2178_s0 + $0xc8] sm:$0xff]  ;;  %v1218_v27 = vld [vmem:[%s2178_s0 + $0xd0] sm:$0xff] }
   0x8   :  { %1229 = vmatpush.bf16.msra.mxu2 %v373_v3  ;;  %1230 = vmatpush.bf16.msra.mxu3 %v373_v3  ;;  %v1204_v21 = vld [vmem:[%s2178_s0 + $0x60] sm:$0xff]  ;;  %v1197_v24 = vld [vmem:[%s2178_s0 + $0x28] sm:$0xff]  ;;  %v1198_v28 = vld [vmem:[%s2178_s0 + $0x30] sm:$0xff] }
   0x9   :  { %v1205_v25 = vld [vmem:[%s2178_s0 + $0x68] sm:$0xff]  ;;  %v1212_v26 = vld [vmem:[%s2178_s0 + $0xa0] sm:$0xff]  ;;  %v1206_v29 = vld [vmem:[%s2178_s0 + $0x70] sm:$0xff] }
   0xa   :  { %v1213_v30 = vld [vmem:[%s2178_s0 + $0xa8] sm:$0xff]  ;;  %v1219_v31 = vld [vmem:[%s2178_s0 + $0xd8] sm:$0xff]  ;;  %v1214_v34 = vld [vmem:[%s2178_s0 + $0xb0] sm:$0xff] }
   0xb   :  { %379 = vmatpush.bf16.msra.mxu0 %v1227_v4  ;;  %1231 = vmatpush.bf16.msra.mxu1 %v1227_v4  ;;  %v1199_v32 = vld [vmem:[%s2178_s0 + $0x38] sm:$0xff]  ;;  %v1220_v35 = vld [vmem:[%s2178_s0 + $0xe0] sm:$0xff]  ;;  %v1221_v41 = vld [vmem:[%s2178_s0 + $0xe8] sm:$0xff] }
   0xc   :  { %1232 = vmatpush.bf16.msra.mxu2 %v1227_v4  ;;  %1233 = vmatpush.bf16.msra.mxu3 %v1227_v4  ;;  %v1207_v33 = vld [vmem:[%s2178_s0 + $0x78] sm:$0xff]  ;;  %v1222_v62 = vld [vmem:[%s2178_s0 + $0xf0] sm:$0xff] }
   0xd   :  { %v1215_v40 = vld [vmem:[%s2178_s0 + $0xb8] sm:$0xff] }
   0xf   :  { %380 = vmatpush.bf16.msra.mxu0 %v1226_v5  ;;  %1234 = vmatpush.bf16.msra.mxu1 %v1226_v5 }
  0x10   :  { %1235 = vmatpush.bf16.msra.mxu2 %v1226_v5  ;;  %1236 = vmatpush.bf16.msra.mxu3 %v1226_v5 }
  0x13   :  { %381 = vmatpush.bf16.msra.mxu0 %v1225_v6  ;;  %1237 = vmatpush.bf16.msra.mxu1 %v1225_v6 }
  0x14   :  { %1238 = vmatpush.bf16.msra.mxu2 %v1225_v6  ;;  %1239 = vmatpush.bf16.msra.mxu3 %v1225_v6 }
  0x17   :  { %382 = vmatpush.bf16.msra.mxu0 %v1224_v7  ;;  %1240 = vmatpush.bf16.msra.mxu1 %v1224_v7 }
  0x18   :  { %1241 = vmatpush.bf16.msra.mxu2 %v1224_v7  ;;  %1242 = vmatpush.bf16.msra.mxu3 %v1224_v7 }
  0x1a   :  { %1160 = vmatmul.msk.bf16.vlgmr.msra.gmra.mxu0 %vm274_vm1, %v1192_v8  ;;  %1168 = vmatmul.msk.bf16.vlgmr.msra.gmra.mxu1 %vm274_vm1, %v1200_v9 }
  0x1b   :  { %1176 = vmatmul.msk.bf16.vlgmr.msra.gmra.mxu2 %vm274_vm1, %v1208_v12  ;;  %1184 = vmatmul.msk.bf16.vlgmr.msra.gmra.mxu3 %vm274_vm1, %v1216_v19 }
  0x2a   :  { %1161 = vmatmul.msk.bf16.gmra.mxu0 %vm274_vm1, %v1193_v10  ;;  %1169 = vmatmul.msk.bf16.gmra.mxu1 %vm274_vm1, %v1201_v11 }
  0x2b   :  { %1177 = vmatmul.msk.bf16.gmra.mxu2 %vm274_vm1, %v1209_v15  ;;  %1185 = vmatmul.msk.bf16.gmra.mxu3 %vm274_vm1, %v1217_v23 }
  0x3a   :  { %1162 = vmatmul.msk.bf16.gmra.mxu0 %vm274_vm1, %v1194_v13  ;;  %1170 = vmatmul.msk.bf16.gmra.mxu1 %vm274_vm1, %v1202_v14 }
  0x3b   :  { %1178 = vmatmul.msk.bf16.gmra.mxu2 %vm274_vm1, %v1210_v18  ;;  %1186 = vmatmul.msk.bf16.gmra.mxu3 %vm274_vm1, %v1218_v27 }
  0x4a   :  { %1163 = vmatmul.msk.bf16.gmra.mxu0 %vm274_vm1, %v1195_v16  ;;  %1171 = vmatmul.msk.bf16.gmra.mxu1 %vm274_vm1, %v1203_v17 }
  0x4b   :  { %1179 = vmatmul.msk.bf16.gmra.mxu2 %vm274_vm1, %v1211_v22  ;;  %1187 = vmatmul.msk.bf16.gmra.mxu3 %vm274_vm1, %v1219_v31 }
  0x5a   :  { %1164 = vmatmul.msk.bf16.gmra.mxu0 %vm274_vm1, %v1196_v20  ;;  %1172 = vmatmul.msk.bf16.gmra.mxu1 %vm274_vm1, %v1204_v21  ;;  %v1223_v21 = vld [vmem:[%s2178_s0 + $0xf8] sm:$0xff] }
  0x5b   :  { %1180 = vmatmul.msk.bf16.gmra.mxu2 %vm274_vm1, %v1212_v26  ;;  %1188 = vmatmul.msk.bf16.gmra.mxu3 %vm274_vm1, %v1220_v35 }
  0x6a   :  { %1165 = vmatmul.msk.bf16.gmra.mxu0 %vm274_vm1, %v1197_v24  ;;  %1173 = vmatmul.msk.bf16.gmra.mxu1 %vm274_vm1, %v1205_v25 }
  0x6b   :  { %1181 = vmatmul.msk.bf16.gmra.mxu2 %vm274_vm1, %v1213_v30  ;;  %1189 = vmatmul.msk.bf16.gmra.mxu3 %vm274_vm1, %v1221_v41 }
  0x7a   :  { %1166 = vmatmul.msk.bf16.gmra.mxu0 %vm274_vm1, %v1198_v28  ;;  %1174 = vmatmul.msk.bf16.gmra.mxu1 %vm274_vm1, %v1206_v29 }
  0x7b   :  { %1182 = vmatmul.msk.bf16.gmra.mxu2 %vm274_vm1, %v1214_v34  ;;  %1190 = vmatmul.msk.bf16.gmra.mxu3 %vm274_vm1, %v1222_v62 }
  0x8a   :  { %1167 = vmatmul.msk.bf16.gmra.mxu0 %vm274_vm1, %v1199_v32  ;;  %1175 = vmatmul.msk.bf16.gmra.mxu1 %vm274_vm1, %v1207_v33 }
  0x8b   :  { %1183 = vmatmul.msk.bf16.gmra.mxu2 %vm274_vm1, %v1215_v40  ;;  %1191 = vmatmul.msk.bf16.gmra.mxu3 %vm274_vm1, %v1223_v21 }
  0x97   :  { %v384_v36 = vpop.f32.mrf.mxu0  ;;  %v1390_v37 = vpop.f32.mrf.mxu1 }
  0x98   :  { %v544_v38 = vpack.c.bf16 %v384_v36, %v384_v36  ;;  %v560_v39 = vpack.c.bf16 %v1390_v37, %v1390_v37  ;;  %v807_v42 = vmul.f32 %v384_v36, %v384_v36  ;;  %v674_v43 = vsel %vm673_vm3, %v384_v36, 0.0 }
  0x9a   :  { %609 = vst.msk [vmem:[%s2179_s2] sm:$0xf] %vm608_vm2, %v544_v38  ;;  %v871_v51 = vsel %vm673_vm3, %v807_v42, 0.0 }
  0x9b   :  { %625 = vst.msk [vmem:[%s2179_s2 + $0x40] sm:$0xf] %vm608_vm2, %v560_v39 }
  0x9e   :  { %v1449_v6 = vpop.f32.mrf.mxu2  ;;  %v1554_v41 = vpop.f32.mrf.mxu3 }
  0x9f   :  { %v386_v44 = vpop.f32.mrf.mxu0  ;;  %v1411_v45 = vpop.f32.mrf.mxu1  ;;  %v576_v10 = vpack.c.bf16 %v1449_v6, %v1449_v6 }
  0xa0   :  { %v545_v46 = vpack.c.bf16 %v386_v44, %v386_v44  ;;  %v675_v47 = vsel %vm673_vm3, %v386_v44, 0.0  ;;  %v808_v48 = vmul.f32 %v386_v44, %v386_v44  ;;  %v561_v49 = vpack.c.bf16 %v1411_v45, %v1411_v45 }
  0xa1   :  { %v676_v50 = vadd.f32 %v675_v47, %v674_v43  ;;  %641 = vst.msk [vmem:[%s2179_s2 + $0x80] sm:$0xf] %vm608_vm2, %v576_v10  ;;  %v592_v43 = vpack.c.bf16 %v1554_v41, %v1554_v41 }
  0xa2   :  { %610 = vst.msk [vmem:[%s2179_s2 + $0x4] sm:$0xf] %vm608_vm2, %v545_v46  ;;  %v872_v52 = vsel %vm673_vm3, %v808_v48, 0.0 }
  0xa3   :  { %v873_v53 = vadd.f32 %v872_v52, %v871_v51  ;;  %626 = vst.msk [vmem:[%s2179_s2 + $0x44] sm:$0xf] %vm608_vm2, %v561_v49 }
  0xa4   :  { %657 = vst.msk [vmem:[%s2179_s2 + $0xc0] sm:$0xf] %vm608_vm2, %v592_v43 }
  0xa6   :  { %v1471_v17 = vpop.f32.mrf.mxu2 }
  0xa7   :  { %v389_v54 = vpop.f32.mrf.mxu0  ;;  %v1426_v55 = vpop.f32.mrf.mxu1  ;;  %v577_v19 = vpack.c.bf16 %v1471_v17, %v1471_v17 }
  0xa8   :  { %v546_v56 = vpack.c.bf16 %v389_v54, %v389_v54  ;;  %v677_v57 = vsel %vm673_vm3, %v389_v54, 0.0  ;;  %v809_v58 = vmul.f32 %v389_v54, %v389_v54  ;;  %v562_v59 = vpack.c.bf16 %v1426_v55, %v1426_v55 }
  0xa9   :  { %v678_v60 = vadd.f32 %v677_v57, %v676_v50  ;;  %642 = vst.msk [vmem:[%s2179_s2 + $0x84] sm:$0xf] %vm608_vm2, %v577_v19  ;;  %v1586_v50 = vpop.f32.mrf.mxu3 }
  0xaa   :  { %611 = vst.msk [vmem:[%s2179_s2 + $0x8] sm:$0xf] %vm608_vm2, %v546_v56  ;;  %v874_v61 = vsel %vm673_vm3, %v809_v58, 0.0  ;;  %v593_v52 = vpack.c.bf16 %v1586_v50, %v1586_v50 }
  0xab   :  { %v875_v63 = vadd.f32 %v874_v61, %v873_v53  ;;  %627 = vst.msk [vmem:[%s2179_s2 + $0x48] sm:$0xf] %vm608_vm2, %v562_v59 }
  0xac   :  { %658 = vst.msk [vmem:[%s2179_s2 + $0xc4] sm:$0xf] %vm608_vm2, %v593_v52 }
  0xae   :  { %v1504_v27 = vpop.f32.mrf.mxu2 }
  0xaf   :  { %v391_v0 = vpop.f32.mrf.mxu0  ;;  %v1444_v1 = vpop.f32.mrf.mxu1  ;;  %v578_v28 = vpack.c.bf16 %v1504_v27, %v1504_v27 }
  0xb0   :  { %v547_v2 = vpack.c.bf16 %v391_v0, %v391_v0  ;;  %v679_v3 = vsel %vm673_vm3, %v391_v0, 0.0  ;;  %v810_v4 = vmul.f32 %v391_v0, %v391_v0  ;;  %v563_v5 = vpack.c.bf16 %v1444_v1, %v1444_v1 }
  0xb1   :  { %v680_v7 = vadd.f32 %v679_v3, %v678_v60  ;;  %643 = vst.msk [vmem:[%s2179_s2 + $0x88] sm:$0xf] %vm608_vm2, %v578_v28  ;;  %v1618_v59 = vpop.f32.mrf.mxu3 }
  0xb2   :  { %612 = vst.msk [vmem:[%s2179_s2 + $0xc] sm:$0xf] %vm608_vm2, %v547_v2  ;;  %v876_v8 = vsel %vm673_vm3, %v810_v4, 0.0  ;;  %v594_v61 = vpack.c.bf16 %v1618_v59, %v1618_v59 }
  0xb3   :  { %v877_v9 = vadd.f32 %v876_v8, %v875_v63  ;;  %628 = vst.msk [vmem:[%s2179_s2 + $0x4c] sm:$0xf] %vm608_vm2, %v563_v5 }
  0xb4   :  { %659 = vst.msk [vmem:[%s2179_s2 + $0xc8] sm:$0xf] %vm608_vm2, %v594_v61 }
  0xb6   :  { %v1528_v33 = vpop.f32.mrf.mxu2 }
  0xb7   :  { %v394_v11 = vpop.f32.mrf.mxu0  ;;  %v1466_v12 = vpop.f32.mrf.mxu1  ;;  %v579_v34 = vpack.c.bf16 %v1528_v33, %v1528_v33 }
  0xb8   :  { %v548_v13 = vpack.c.bf16 %v394_v11, %v394_v11  ;;  %v681_v14 = vsel %vm673_vm3, %v394_v11, 0.0  ;;  %v811_v15 = vmul.f32 %v394_v11, %v394_v11  ;;  %v564_v16 = vpack.c.bf16 %v1466_v12, %v1466_v12 }
  0xb9   :  { %v1473_v18 = vadd.f32 %v681_v14, %v680_v7  ;;  %644 = vst.msk [vmem:[%s2179_s2 + $0x8c] sm:$0xf] %vm608_vm2, %v579_v34  ;;  %v1650_v4 = vpop.f32.mrf.mxu3 }
  0xba   :  { %613 = vst.msk [vmem:[%s2179_s2 + $0x10] sm:$0xf] %vm608_vm2, %v548_v13  ;;  %v878_v20 = vsel %vm673_vm3, %v811_v15, 0.0  ;;  %v595_v7 = vpack.c.bf16 %v1650_v4, %v1650_v4 }
  0xbb   :  { %v1485_v22 = vadd.f32 %v878_v20, %v877_v9  ;;  %629 = vst.msk [vmem:[%s2179_s2 + $0x50] sm:$0xf] %vm608_vm2, %v564_v16 }
  0xbc   :  { %660 = vst.msk [vmem:[%s2179_s2 + $0xcc] sm:$0xf] %vm608_vm2, %v595_v7 }
  0xbe   :  { %v1552_v40 = vpop.f32.mrf.mxu2 }
  0xbf   :  { %v1496_v23 = vpop.f32.mrf.mxu0  ;;  %v1498_v24 = vpop.f32.mrf.mxu1  ;;  %v580_v42 = vpack.c.bf16 %v1552_v40, %v1552_v40 }
  0xc0   :  { %v549_v25 = vpack.c.bf16 %v1496_v23, %v1496_v23  ;;  %v565_v26 = vpack.c.bf16 %v1498_v24, %v1498_v24  ;;  %v812_v19 = vmul.f32 %v1496_v23, %v1496_v23 }
  0xc1   :  { %645 = vst.msk [vmem:[%s2179_s2 + $0x90] sm:$0xf] %vm608_vm2, %v580_v42  ;;  %v1678_v14 = vpop.f32.mrf.mxu3 }
  0xc2   :  { %614 = vst.msk [vmem:[%s2179_s2 + $0x14] sm:$0xf] %vm608_vm2, %v549_v25  ;;  %v596_v34 = vpack.c.bf16 %v1678_v14, %v1678_v14 }
  0xc3   :  { %630 = vst.msk [vmem:[%s2179_s2 + $0x54] sm:$0xf] %vm608_vm2, %v565_v26 }
  0xc4   :  { %661 = vst.msk [vmem:[%s2179_s2 + $0xd0] sm:$0xf] %vm608_vm2, %v596_v34 }
  0xc6   :  { %v1584_v49 = vpop.f32.mrf.mxu2 }
  0xc7   :  { %v1520_v29 = vpop.f32.mrf.mxu0  ;;  %v1522_v30 = vpop.f32.mrf.mxu1  ;;  %v581_v51 = vpack.c.bf16 %v1584_v49, %v1584_v49 }
  0xc8   :  { %v550_v31 = vpack.c.bf16 %v1520_v29, %v1520_v29  ;;  %v566_v32 = vpack.c.bf16 %v1522_v30, %v1522_v30 }
  0xc9   :  { %646 = vst.msk [vmem:[%s2179_s2 + $0x94] sm:$0xf] %vm608_vm2, %v581_v51  ;;  %v1696_v26 = vpop.f32.mrf.mxu3 }
  0xca   :  { %615 = vst.msk [vmem:[%s2179_s2 + $0x18] sm:$0xf] %vm608_vm2, %v550_v31  ;;  %v683_v31 = vsel %vm673_vm3, %v1496_v23, 0.0  ;;  %v880_v23 = vsel %vm673_vm3, %v812_v19, 0.0 }
  0xcb   :  { %631 = vst.msk [vmem:[%s2179_s2 + $0x58] sm:$0xf] %vm608_vm2, %v566_v32  ;;  %v813_v32 = vmul.f32 %v1520_v29, %v1520_v29  ;;  %v684_v43 = vadd.f32 %v683_v31, %v1473_v18  ;;  %v881_v18 = vadd.f32 %v880_v23, %v1485_v22 }
  0xce   :  { %v1616_v58 = vpop.f32.mrf.mxu2 }
  0xcf   :  { %v1544_v35 = vpop.f32.mrf.mxu0  ;;  %v1546_v36 = vpop.f32.mrf.mxu1  ;;  %v582_v60 = vpack.c.bf16 %v1616_v58, %v1616_v58 }
  0xd0   :  { %v551_v38 = vpack.c.bf16 %v1544_v35, %v1544_v35  ;;  %v567_v39 = vpack.c.bf16 %v1546_v36, %v1546_v36 }
  0xd1   :  { %647 = vst.msk [vmem:[%s2179_s2 + $0x98] sm:$0xf] %vm608_vm2, %v582_v60 }
  0xd2   :  { %616 = vst.msk [vmem:[%s2179_s2 + $0x1c] sm:$0xf] %vm608_vm2, %v551_v38  ;;  %v814_v38 = vmul.f32 %v1544_v35, %v1544_v35 }
  0xd3   :  { %632 = vst.msk [vmem:[%s2179_s2 + $0x5c] sm:$0xf] %vm608_vm2, %v567_v39  ;;  %v685_v39 = vsel %vm673_vm3, %v1520_v29, 0.0  ;;  %v882_v29 = vsel %vm673_vm3, %v813_v32, 0.0 }
  0xd4   :  { %v686_v52 = vadd.f32 %v685_v39, %v684_v43  ;;  %v883_v7 = vadd.f32 %v882_v29, %v881_v18 }
  0xd6   :  { %v1648_v3 = vpop.f32.mrf.mxu2 }
  0xd7   :  { %v1576_v44 = vpop.f32.mrf.mxu0  ;;  %v1578_v46 = vpop.f32.mrf.mxu1  ;;  %v583_v5 = vpack.c.bf16 %v1648_v3, %v1648_v3 }
  0xd8   :  { %v552_v47 = vpack.c.bf16 %v1576_v44, %v1576_v44  ;;  %v568_v48 = vpack.c.bf16 %v1578_v46, %v1578_v46  ;;  %v815_v51 = vmul.f32 %v1576_v44, %v1576_v44 }
  0xd9   :  { %648 = vst.msk [vmem:[%s2179_s2 + $0x9c] sm:$0xf] %vm608_vm2, %v583_v5  ;;  %v1757_v5 = vpop.f32.mrf.mxu3 }
  0xda   :  { %617 = vst.msk [vmem:[%s2179_s2 + $0x20] sm:$0xf] %vm608_vm2, %v552_v47  ;;  %v597_v47 = vpack.c.bf16 %v1696_v26, %v1696_v26 }
  0xdb   :  { %633 = vst.msk [vmem:[%s2179_s2 + $0x60] sm:$0xf] %vm608_vm2, %v568_v48  ;;  %v687_v48 = vsel %vm673_vm3, %v1544_v35, 0.0  ;;  %v689_v35 = vsel %vm673_vm3, %v1576_v44, 0.0 }
  0xdc   :  { %662 = vst.msk [vmem:[%s2179_s2 + $0xd4] sm:$0xf] %vm608_vm2, %v597_v47 }
  0xde   :  { %v1676_v13 = vpop.f32.mrf.mxu2 }
  0xdf   :  { %v1608_v53 = vpop.f32.mrf.mxu0  ;;  %v1610_v54 = vpop.f32.mrf.mxu1  ;;  %v584_v28 = vpack.c.bf16 %v1676_v13, %v1676_v13 }
  0xe0   :  { %v553_v56 = vpack.c.bf16 %v1608_v53, %v1608_v53  ;;  %v569_v57 = vpack.c.bf16 %v1610_v54, %v1610_v54  ;;  %v816_v61 = vmul.f32 %v1608_v53, %v1608_v53  ;;  %v691_v19 = vsel %vm673_vm3, %v1608_v53, 0.0 }
  0xe1   :  { %649 = vst.msk [vmem:[%s2179_s2 + $0xa0] sm:$0xf] %vm608_vm2, %v584_v28 }
  0xe2   :  { %618 = vst.msk [vmem:[%s2179_s2 + $0x24] sm:$0xf] %vm608_vm2, %v553_v56  ;;  %v884_v56 = vsel %vm673_vm3, %v814_v38, 0.0  ;;  %v888_v31 = vsel %vm673_vm3, %v816_v61, 0.0 }
  0xe3   :  { %634 = vst.msk [vmem:[%s2179_s2 + $0x64] sm:$0xf] %vm608_vm2, %v569_v57 }
  0xe6   :  { %v1694_v25 = vpop.f32.mrf.mxu2 }
  0xe7   :  { %v1640_v62 = vpop.f32.mrf.mxu0  ;;  %v1642_v63 = vpop.f32.mrf.mxu1  ;;  %v585_v42 = vpack.c.bf16 %v1694_v25, %v1694_v25 }
  0xe8   :  { %v554_v0 = vpack.c.bf16 %v1640_v62, %v1640_v62  ;;  %v570_v2 = vpack.c.bf16 %v1642_v63, %v1642_v63  ;;  %v817_v44 = vmul.f32 %v1640_v62, %v1640_v62  ;;  %v693_v53 = vsel %vm673_vm3, %v1640_v62, 0.0 }
  0xe9   :  { %650 = vst.msk [vmem:[%s2179_s2 + $0xa4] sm:$0xf] %vm608_vm2, %v585_v42 }
  0xea   :  { %619 = vst.msk [vmem:[%s2179_s2 + $0x28] sm:$0xf] %vm608_vm2, %v554_v0  ;;  %v890_v38 = vsel %vm673_vm3, %v817_v44, 0.0 }
  0xeb   :  { %635 = vst.msk [vmem:[%s2179_s2 + $0x68] sm:$0xf] %vm608_vm2, %v570_v2 }
  0xee   :  { %v1755_v2 = vpop.f32.mrf.mxu2 }
  0xef   :  { %v411_v8 = vpop.f32.mrf.mxu0  ;;  %v1672_v9 = vpop.f32.mrf.mxu1 }
  0xf0   :  { %v555_v10 = vpack.c.bf16 %v411_v8, %v411_v8  ;;  %v571_v11 = vpack.c.bf16 %v1672_v9, %v1672_v9  ;;  %v818_v28 = vmul.f32 %v411_v8, %v411_v8  ;;  %v695_v23 = vsel %vm673_vm3, %v411_v8, 0.0 }
  0xf2   :  { %620 = vst.msk [vmem:[%s2179_s2 + $0x2c] sm:$0xf] %vm608_vm2, %v555_v10  ;;  %v688_v10 = vadd.f32 %v687_v48, %v686_v52  ;;  %v892_v47 = vsel %vm673_vm3, %v818_v28, 0.0 }
  0xf3   :  { %636 = vst.msk [vmem:[%s2179_s2 + $0x6c] sm:$0xf] %vm608_vm2, %v571_v11  ;;  %v886_v11 = vsel %vm673_vm3, %v815_v51, 0.0 }
  0xf7   :  { %v414_v15 = vpop.f32.mrf.mxu0  ;;  %v1688_v16 = vpop.f32.mrf.mxu1 }
  0xf8   :  { %v556_v20 = vpack.c.bf16 %v414_v15, %v414_v15  ;;  %v572_v21 = vpack.c.bf16 %v1688_v16, %v1688_v16  ;;  %v819_v39 = vmul.f32 %v414_v15, %v414_v15  ;;  %v697_v51 = vsel %vm673_vm3, %v414_v15, 0.0 }
  0xfa   :  { %621 = vst.msk [vmem:[%s2179_s2 + $0x30] sm:$0xf] %vm608_vm2, %v556_v20  ;;  %v885_v20 = vadd.f32 %v884_v56, %v883_v7  ;;  %v1783_v56 = vpop.f32.mrf.mxu2 }
  0xfb   :  { %637 = vst.msk [vmem:[%s2179_s2 + $0x70] sm:$0xf] %vm608_vm2, %v572_v21  ;;  %v690_v21 = vadd.f32 %v689_v35, %v688_v10  ;;  %v1785_v35 = vpop.f32.mrf.mxu3  ;;  %v598_v10 = vpack.c.bf16 %v1757_v5, %v1757_v5 }
  0xfc   :  { %v887_v32 = vadd.f32 %v886_v11, %v885_v20  ;;  %v587_v20 = vpack.c.bf16 %v1783_v56, %v1783_v56 }
  0xfd   :  { %v692_v34 = vadd.f32 %v691_v19, %v690_v21  ;;  %663 = vst.msk [vmem:[%s2179_s2 + $0xd8] sm:$0xf] %vm608_vm2, %v598_v10  ;;  %v707_v10 = vsel %vm673_vm3, %v1411_v45, 0.0 }
  0xfe   :  { %v889_v42 = vadd.f32 %v888_v31, %v887_v32  ;;  %v599_v31 = vpack.c.bf16 %v1785_v35, %v1785_v35  ;;  %652 = vst.msk [vmem:[%s2179_s2 + $0xac] sm:$0xf] %vm608_vm2, %v587_v20  ;;  %v823_v32 = vmul.f32 %v1390_v37, %v1390_v37  ;;  %v826_v20 = vmul.f32 %v1444_v1, %v1444_v1 }
  0xff   :  { %v416_v57 = vpop.f32.mrf.mxu0  ;;  %v1743_v60 = vpop.f32.mrf.mxu1  ;;  %v694_v43 = vadd.f32 %v693_v53, %v692_v34 }
 0x100   :  { %v557_v0 = vpack.c.bf16 %v416_v57, %v416_v57  ;;  %v573_v22 = vpack.c.bf16 %v1743_v60, %v1743_v60  ;;  %v820_v18 = vmul.f32 %v416_v57, %v416_v57  ;;  %v891_v8 = vadd.f32 %v890_v38, %v889_v42  ;;  %664 = vst.msk [vmem:[%s2179_s2 + $0xdc] sm:$0xf] %vm608_vm2, %v599_v31 }
 0x101   :  { %v696_v61 = vadd.f32 %v695_v23, %v694_v43  ;;  %v699_v7 = vsel %vm673_vm3, %v416_v57, 0.0 }
 0x102   :  { %622 = vst.msk [vmem:[%s2179_s2 + $0x34] sm:$0xf] %vm608_vm2, %v557_v0  ;;  %v586_v0 = vpack.c.bf16 %v1755_v2, %v1755_v2  ;;  %v893_v11 = vadd.f32 %v892_v47, %v891_v8  ;;  %v896_v44 = vsel %vm673_vm3, %v820_v18, 0.0  ;;  %v705_v8 = vsel %vm673_vm3, %v1390_v37, 0.0 }
 0x103   :  { %638 = vst.msk [vmem:[%s2179_s2 + $0x74] sm:$0xf] %vm608_vm2, %v573_v22  ;;  %v894_v22 = vsel %vm673_vm3, %v819_v39, 0.0  ;;  %v698_v19 = vadd.f32 %v697_v51, %v696_v61  ;;  %v1831_v51 = vpop.f32.mrf.mxu2  ;;  %v1833_v18 = vpop.f32.mrf.mxu3  ;;  %v824_v61 = vmul.f32 %v1411_v45, %v1411_v45  ;;  %v902_v37 = vsel %vm673_vm3, %v823_v32, 0.0 }
 0x104   :  { %651 = vst.msk [vmem:[%s2179_s2 + $0xa8] sm:$0xf] %vm608_vm2, %v586_v0  ;;  %v895_v21 = vadd.f32 %v894_v22, %v893_v11  ;;  %v825_v22 = vmul.f32 %v1426_v55, %v1426_v55  ;;  %v827_v45 = vmul.f32 %v1466_v12, %v1466_v12  ;;  %v588_v32 = vpack.c.bf16 %v1831_v51, %v1831_v51 }
 0x105   :  { %v700_v28 = vadd.f32 %v699_v7, %v698_v19 }
 0x106   :  { %v897_v34 = vadd.f32 %v896_v44, %v895_v21  ;;  %v904_v44 = vsel %vm673_vm3, %v824_v61, 0.0  ;;  %v906_v21 = vsel %vm673_vm3, %v825_v22, 0.0  ;;  %653 = vst.msk [vmem:[%s2179_s2 + $0xb0] sm:$0xf] %vm608_vm2, %v588_v32  ;;  %v715_v61 = vsel %vm673_vm3, %v1498_v24, 0.0 }
 0x107   :  { %v419_v29 = vpop.f32.mrf.mxu0  ;;  %v1778_v48 = vpop.f32.mrf.mxu1 }
 0x108   :  { %v558_v52 = vpack.c.bf16 %v419_v29, %v419_v29  ;;  %v574_v62 = vpack.c.bf16 %v1778_v48, %v1778_v48  ;;  %v821_v15 = vmul.f32 %v419_v29, %v419_v29  ;;  %v701_v57 = vsel %vm673_vm3, %v419_v29, 0.0 }
 0x109   :  { %v702_v38 = vadd.f32 %v701_v57, %v700_v28  ;;  %v709_v57 = vsel %vm673_vm3, %v1426_v55, 0.0 }
 0x10a   :  { %623 = vst.msk [vmem:[%s2179_s2 + $0x38] sm:$0xf] %vm608_vm2, %v558_v52  ;;  %v898_v53 = vsel %vm673_vm3, %v821_v15, 0.0 }
 0x10b   :  { %639 = vst.msk [vmem:[%s2179_s2 + $0x78] sm:$0xf] %vm608_vm2, %v574_v62  ;;  %v899_v52 = vadd.f32 %v898_v53, %v897_v34  ;;  %v711_v53 = vsel %vm673_vm3, %v1444_v1, 0.0  ;;  %v600_v34 = vpack.c.bf16 %v1833_v18, %v1833_v18  ;;  %v1867_v55 = vpop.f32.mrf.mxu2  ;;  %v713_v1 = vsel %vm673_vm3, %v1466_v12, 0.0 }
 0x10d   :  { %665 = vst.msk [vmem:[%s2179_s2 + $0xe0] sm:$0xf] %vm608_vm2, %v600_v34 }
 0x10f   :  { %v421_v23 = vpop.f32.mrf.mxu0  ;;  %v1822_v39 = vpop.f32.mrf.mxu1 }
 0x110   :  { %v559_v42 = vpack.c.bf16 %v421_v23, %v421_v23  ;;  %v703_v43 = vsel %vm673_vm3, %v421_v23, 0.0  ;;  %v822_v47 = vmul.f32 %v421_v23, %v421_v23  ;;  %v575_v29 = vpack.c.bf16 %v1822_v39, %v1822_v39 }
 0x111   :  { %v704_v62 = vadd.f32 %v703_v43, %v702_v38  ;;  %v1869_v38 = vpop.f32.mrf.mxu3  ;;  %v908_v43 = vsel %vm673_vm3, %v826_v20, 0.0 }
 0x112   :  { %624 = vst.msk [vmem:[%s2179_s2 + $0x3c] sm:$0xf] %vm608_vm2, %v559_v42  ;;  %v900_v0 = vsel %vm673_vm3, %v822_v47, 0.0  ;;  %v828_v47 = vmul.f32 %v1498_v24, %v1498_v24  ;;  %v601_v12 = vpack.c.bf16 %v1869_v38, %v1869_v38  ;;  %v717_v24 = vsel %vm673_vm3, %v1522_v30, 0.0 }
 0x113   :  { %v706_v7 = vadd.f32 %v705_v8, %v704_v62  ;;  %v901_v15 = vadd.f32 %v900_v0, %v899_v52  ;;  %640 = vst.msk [vmem:[%s2179_s2 + $0x7c] sm:$0xf] %vm608_vm2, %v575_v29  ;;  %v589_v29 = vpack.c.bf16 %v1867_v55, %v1867_v55  ;;  %v910_v8 = vsel %vm673_vm3, %v827_v45, 0.0  ;;  %v1911_v20 = vpop.f32.mrf.mxu2 }
 0x114   :  { %v829_v0 = vmul.f32 %v1522_v30, %v1522_v30  ;;  %666 = vst.msk [vmem:[%s2179_s2 + $0xe4] sm:$0xf] %vm608_vm2, %v601_v12  ;;  %v832_v45 = vmul.f32 %v1610_v54, %v1610_v54 }
 0x115   :  { %v708_v11 = vadd.f32 %v707_v10, %v706_v7  ;;  %v903_v19 = vadd.f32 %v902_v37, %v901_v15  ;;  %654 = vst.msk [vmem:[%s2179_s2 + $0xb4] sm:$0xf] %vm608_vm2, %v589_v29  ;;  %v912_v15 = vsel %vm673_vm3, %v828_v47, 0.0  ;;  %v830_v37 = vmul.f32 %v1546_v36, %v1546_v36 }
 0x116   :  { %v920_v47 = vsel %vm673_vm3, %v832_v45, 0.0  ;;  %v834_v29 = vmul.f32 %v1672_v9, %v1672_v9  ;;  %v838_v45 = vmul.f32 %v1822_v39, %v1822_v39 }
 0x117   :  { %v710_v28 = vadd.f32 %v709_v57, %v708_v11  ;;  %v905_v31 = vadd.f32 %v904_v44, %v903_v19  ;;  %v914_v19 = vsel %vm673_vm3, %v829_v0, 0.0  ;;  %v719_v44 = vsel %vm673_vm3, %v1546_v36, 0.0 }
 0x118   :  { %v831_v57 = vmul.f32 %v1578_v46, %v1578_v46  ;;  %v916_v30 = vsel %vm673_vm3, %v830_v37, 0.0  ;;  %v833_v36 = vmul.f32 %v1642_v63, %v1642_v63  ;;  %v836_v37 = vmul.f32 %v1743_v60, %v1743_v60 }
 0x119   :  { %v712_v23 = vadd.f32 %v711_v53, %v710_v28  ;;  %v907_v42 = vadd.f32 %v906_v21, %v905_v31  ;;  %v1913_v21 = vpop.f32.mrf.mxu3  ;;  %v721_v53 = vsel %vm673_vm3, %v1578_v46, 0.0  ;;  %v725_v46 = vsel %vm673_vm3, %v1642_v63, 0.0 }
 0x11a   :  { %v602_v0 = vpack.c.bf16 %v1913_v21, %v1913_v21 }
 0x11b   :  { %v714_v52 = vadd.f32 %v713_v1, %v712_v23  ;;  %v909_v62 = vadd.f32 %v908_v43, %v907_v42  ;;  %v918_v23 = vsel %vm673_vm3, %v831_v57, 0.0  ;;  %v723_v42 = vsel %vm673_vm3, %v1610_v54, 0.0  ;;  %v1939_v63 = vpop.f32.mrf.mxu2 }
 0x11c   :  { %v835_v54 = vmul.f32 %v1688_v16, %v1688_v16  ;;  %667 = vst.msk [vmem:[%s2179_s2 + $0xe8] sm:$0xf] %vm608_vm2, %v602_v0  ;;  %v731_v57 = vsel %vm673_vm3, %v1743_v60, 0.0  ;;  %v733_v60 = vsel %vm673_vm3, %v1778_v48, 0.0 }
 0x11d   :  { %v716_v22 = vadd.f32 %v715_v61, %v714_v52  ;;  %v911_v7 = vadd.f32 %v910_v8, %v909_v62  ;;  %v922_v52 = vsel %vm673_vm3, %v833_v36, 0.0  ;;  %v727_v8 = vsel %vm673_vm3, %v1672_v9, 0.0 }
 0x11e   :  { %v590_v61 = vpack.c.bf16 %v1911_v20, %v1911_v20  ;;  %v729_v9 = vsel %vm673_vm3, %v1688_v16, 0.0 }
 0x11f   :  { %v913_v10 = vadd.f32 %v912_v15, %v911_v7  ;;  %v718_v11 = vadd.f32 %v717_v24, %v716_v22  ;;  %v924_v24 = vsel %vm673_vm3, %v834_v29, 0.0  ;;  %v932_v29 = vsel %vm673_vm3, %v838_v45, 0.0 }
 0x120   :  { %655 = vst.msk [vmem:[%s2179_s2 + $0xb8] sm:$0xf] %vm608_vm2, %v590_v61 }
 0x121   :  { %v720_v28 = vadd.f32 %v719_v44, %v718_v11  ;;  %v915_v31 = vadd.f32 %v914_v19, %v913_v10  ;;  %v1941_v22 = vpop.f32.mrf.mxu3  ;;  %v591_v10 = vpack.c.bf16 %v1939_v63, %v1939_v63  ;;  %v926_v44 = vsel %vm673_vm3, %v835_v54, 0.0 }
 0x122   :  { %v603_v16 = vpack.c.bf16 %v1941_v22, %v1941_v22 }
 0x123   :  { %v722_v32 = vadd.f32 %v721_v53, %v720_v28  ;;  %v917_v34 = vadd.f32 %v916_v30, %v915_v31  ;;  %v837_v28 = vmul.f32 %v1778_v48, %v1778_v48  ;;  %656 = vst.msk [vmem:[%s2179_s2 + $0xbc] sm:$0xf] %vm608_vm2, %v591_v10  ;;  %v928_v53 = vsel %vm673_vm3, %v836_v37, 0.0 }
 0x124   :  { %668 = vst.msk [vmem:[%s2179_s2 + $0xec] sm:$0xf] %vm608_vm2, %v603_v16  ;;  %v737_v48 = vsel %vm673_vm3, %v1449_v6, 0.0  ;;  %v843_v37 = vmul.f32 %v1552_v40, %v1552_v40 }
 0x125   :  { %v724_v43 = vadd.f32 %v723_v42, %v722_v32  ;;  %v919_v1 = vadd.f32 %v918_v23, %v917_v34  ;;  %v839_v34 = vmul.f32 %v1449_v6, %v1449_v6  ;;  %v930_v23 = vsel %vm673_vm3, %v837_v28, 0.0 }
 0x126   :  { %v735_v42 = vsel %vm673_vm3, %v1822_v39, 0.0  ;;  %v841_v39 = vmul.f32 %v1504_v27, %v1504_v27  ;;  %v741_v6 = vsel %vm673_vm3, %v1504_v27, 0.0 }
 0x127   :  { %v726_v62 = vadd.f32 %v725_v46, %v724_v43  ;;  %v921_v12 = vadd.f32 %v920_v47, %v919_v1  ;;  %v840_v46 = vmul.f32 %v1471_v17, %v1471_v17 }
 0x129   :  { %v728_v7 = vadd.f32 %v727_v8, %v726_v62  ;;  %v923_v15 = vadd.f32 %v922_v52, %v921_v12  ;;  %v1983_v43 = vpop.f32.mrf.mxu3  ;;  %v934_v12 = vsel %vm673_vm3, %v839_v34, 0.0  ;;  %v739_v8 = vsel %vm673_vm3, %v1471_v17, 0.0 }
 0x12a   :  { %v936_v0 = vsel %vm673_vm3, %v840_v46, 0.0  ;;  %v743_v17 = vsel %vm673_vm3, %v1528_v33, 0.0  ;;  %v604_v10 = vpack.c.bf16 %v1983_v43, %v1983_v43  ;;  %v846_v34 = vmul.f32 %v1648_v3, %v1648_v3 }
 0x12b   :  { %v730_v11 = vadd.f32 %v729_v9, %v728_v7  ;;  %v925_v19 = vadd.f32 %v924_v24, %v923_v15  ;;  %v842_v7 = vmul.f32 %v1528_v33, %v1528_v33  ;;  %v938_v9 = vsel %vm673_vm3, %v841_v39, 0.0 }
 0x12c   :  { %v844_v33 = vmul.f32 %v1584_v49, %v1584_v49  ;;  %669 = vst.msk [vmem:[%s2179_s2 + $0xf0] sm:$0xf] %vm608_vm2, %v604_v10 }
 0x12d   :  { %v927_v31 = vadd.f32 %v926_v44, %v925_v19  ;;  %v732_v30 = vadd.f32 %v731_v57, %v730_v11  ;;  %v940_v44 = vsel %vm673_vm3, %v842_v7, 0.0  ;;  %v745_v57 = vsel %vm673_vm3, %v1552_v40, 0.0 }
 0x12e   :  { %v747_v40 = vsel %vm673_vm3, %v1584_v49, 0.0  ;;  %v751_v49 = vsel %vm673_vm3, %v1648_v3, 0.0  ;;  %v755_v3 = vsel %vm673_vm3, %v1694_v25, 0.0  ;;  %v850_v7 = vmul.f32 %v1783_v56, %v1783_v56 }
 0x12f   :  { %v929_v36 = vadd.f32 %v928_v53, %v927_v31  ;;  %v734_v32 = vadd.f32 %v733_v60, %v732_v30  ;;  %v942_v30 = vsel %vm673_vm3, %v843_v37, 0.0  ;;  %v845_v53 = vmul.f32 %v1616_v58, %v1616_v58 }
 0x131   :  { %v931_v1 = vadd.f32 %v930_v23, %v929_v36  ;;  %v736_v47 = vadd.f32 %v735_v42, %v734_v32  ;;  %v2007_v11 = vpop.f32.mrf.mxu3  ;;  %v944_v36 = vsel %vm673_vm3, %v844_v33, 0.0  ;;  %v749_v32 = vsel %vm673_vm3, %v1616_v58, 0.0 }
 0x132   :  { %v605_v16 = vpack.c.bf16 %v2007_v11, %v2007_v11  ;;  %v753_v58 = vsel %vm673_vm3, %v1676_v13, 0.0 }
 0x133   :  { %v738_v52 = vadd.f32 %v737_v48, %v736_v47  ;;  %v933_v62 = vadd.f32 %v932_v29, %v931_v1  ;;  %v946_v1 = vsel %vm673_vm3, %v845_v53, 0.0  ;;  %v847_v47 = vmul.f32 %v1676_v13, %v1676_v13 }
 0x134   :  { %670 = vst.msk [vmem:[%s2179_s2 + $0xf4] sm:$0xf] %vm608_vm2, %v605_v16  ;;  %v757_v13 = vsel %vm673_vm3, %v1755_v2, 0.0  ;;  %v956_v16 = vsel %vm673_vm3, %v850_v7, 0.0 }
 0x135   :  { %v740_v54 = vadd.f32 %v739_v8, %v738_v52  ;;  %v935_v61 = vadd.f32 %v934_v12, %v933_v62  ;;  %v948_v52 = vsel %vm673_vm3, %v846_v34, 0.0  ;;  %v848_v62 = vmul.f32 %v1694_v25, %v1694_v25 }
 0x136   :  { %v950_v39 = vsel %vm673_vm3, %v847_v47, 0.0  ;;  %v759_v25 = vsel %vm673_vm3, %v1783_v56, 0.0  ;;  %v852_v56 = vmul.f32 %v1867_v55, %v1867_v55  ;;  %v855_v34 = vmul.f32 %v1554_v41, %v1554_v41 }
 0x137   :  { %v742_v15 = vadd.f32 %v741_v6, %v740_v54  ;;  %v937_v24 = vadd.f32 %v936_v0, %v935_v61  ;;  %v849_v54 = vmul.f32 %v1755_v2, %v1755_v2  ;;  %v952_v6 = vsel %vm673_vm3, %v848_v62, 0.0 }
 0x138   :  { %v960_v53 = vsel %vm673_vm3, %v852_v56, 0.0 }
 0x139   :  { %v744_v19 = vadd.f32 %v743_v17, %v742_v15  ;;  %v939_v27 = vadd.f32 %v938_v9, %v937_v24  ;;  %v2039_v48 = vpop.f32.mrf.mxu3  ;;  %v954_v9 = vsel %vm673_vm3, %v849_v54, 0.0  ;;  %v851_v17 = vmul.f32 %v1831_v51, %v1831_v51 }
 0x13a   :  { %v606_v37 = vpack.c.bf16 %v2039_v48, %v2039_v48 }
 0x13b   :  { %v746_v28 = vadd.f32 %v745_v57, %v744_v19  ;;  %v941_v31 = vadd.f32 %v940_v44, %v939_v27  ;;  %v761_v44 = vsel %vm673_vm3, %v1831_v51, 0.0  ;;  %v763_v51 = vsel %vm673_vm3, %v1867_v55, 0.0 }
 0x13c   :  { %671 = vst.msk [vmem:[%s2179_s2 + $0xf8] sm:$0xf] %vm608_vm2, %v606_v37 }
 0x13d   :  { %v748_v60 = vadd.f32 %v747_v40, %v746_v28  ;;  %v943_v45 = vadd.f32 %v942_v30, %v941_v31  ;;  %v958_v28 = vsel %vm673_vm3, %v851_v17, 0.0  ;;  %v853_v31 = vmul.f32 %v1911_v20, %v1911_v20 }
 0x13e   :  { %v861_v17 = vmul.f32 %v1757_v5, %v1757_v5 }
 0x13f   :  { %v945_v23 = vadd.f32 %v944_v36, %v943_v45  ;;  %v750_v42 = vadd.f32 %v749_v32, %v748_v60  ;;  %v765_v60 = vsel %vm673_vm3, %v1911_v20, 0.0  ;;  %v854_v45 = vmul.f32 %v1939_v63, %v1939_v63 }
 0x140   :  { %v962_v55 = vsel %vm673_vm3, %v853_v31, 0.0  ;;  %v856_v20 = vmul.f32 %v1586_v50, %v1586_v50  ;;  %v978_v56 = vsel %vm673_vm3, %v861_v17, 0.0  ;;  %v864_v31 = vmul.f32 %v1869_v38, %v1869_v38 }
 0x141   :  { %v752_v46 = vadd.f32 %v751_v49, %v750_v42  ;;  %v947_v29 = vadd.f32 %v946_v1, %v945_v23  ;;  %v2063_v10 = vpop.f32.mrf.mxu3  ;;  %v767_v23 = vsel %vm673_vm3, %v1939_v63, 0.0  ;;  %v769_v49 = vsel %vm673_vm3, %v1554_v41, 0.0 }
 0x142   :  { %v607_v27 = vpack.c.bf16 %v2063_v10, %v2063_v10  ;;  %v964_v47 = vsel %vm673_vm3, %v854_v45, 0.0  ;;  %v857_v63 = vmul.f32 %v1618_v59, %v1618_v59  ;;  %v773_v41 = vsel %vm673_vm3, %v1618_v59, 0.0 }
 0x143   :  { %v754_v12 = vadd.f32 %v753_v58, %v752_v46  ;;  %v949_v8 = vadd.f32 %v948_v52, %v947_v29  ;;  %v966_v52 = vsel %vm673_vm3, %v855_v34, 0.0  ;;  %v771_v58 = vsel %vm673_vm3, %v1586_v50, 0.0 }
 0x144   :  { %672 = vst.msk [vmem:[%s2179_s2 + $0xfc] sm:$0xf] %vm608_vm2, %v607_v27  ;;  %v775_v50 = vsel %vm673_vm3, %v1650_v4, 0.0  ;;  %v777_v59 = vsel %vm673_vm3, %v1678_v14, 0.0  ;;  %v862_v27 = vmul.f32 %v1785_v35, %v1785_v35  ;;  %v866_v34 = vmul.f32 %v1941_v22, %v1941_v22 }
 0x145   :  { %v756_v61 = vadd.f32 %v755_v3, %v754_v12  ;;  %v951_v0 = vadd.f32 %v950_v39, %v949_v8  ;;  %v968_v8 = vsel %vm673_vm3, %v856_v20, 0.0  ;;  %v858_v39 = vmul.f32 %v1650_v4, %v1650_v4 }
 0x146   :  { %v779_v4 = vsel %vm673_vm3, %v1696_v26, 0.0 }
 0x147   :  { %v758_v15 = vadd.f32 %v757_v13, %v756_v61  ;;  %v953_v24 = vadd.f32 %v952_v6, %v951_v0  ;;  %v970_v61 = vsel %vm673_vm3, %v857_v63, 0.0  ;;  %v859_v0 = vmul.f32 %v1678_v14, %v1678_v14 }
 0x148   :  { %v972_v7 = vsel %vm673_vm3, %v858_v39, 0.0  ;;  %v781_v14 = vsel %vm673_vm3, %v1757_v5, 0.0  ;;  %v785_v5 = vsel %vm673_vm3, %v1833_v18, 0.0  ;;  %v869_v63 = vmul.f32 %v2039_v48, %v2039_v48 }
 0x149   :  { %v760_v19 = vadd.f32 %v759_v25, %v758_v15  ;;  %v955_v2 = vadd.f32 %v954_v9, %v953_v24  ;;  %v860_v15 = vmul.f32 %v1696_v26, %v1696_v26  ;;  %v974_v25 = vsel %vm673_vm3, %v859_v0, 0.0 }
 0x14a   :  { %v783_v26 = vsel %vm673_vm3, %v1785_v35, 0.0  ;;  %v787_v35 = vsel %vm673_vm3, %v1869_v38, 0.0  ;;  %v791_v38 = vsel %vm673_vm3, %v1941_v22, 0.0  ;;  %v795_v22 = vsel %vm673_vm3, %v2007_v11, 0.0 }
 0x14b   :  { %v957_v57 = vadd.f32 %v956_v16, %v955_v2  ;;  %v762_v33 = vadd.f32 %v761_v44, %v760_v19  ;;  %v976_v2 = vsel %vm673_vm3, %v860_v15, 0.0 }
 0x14d   :  { %v959_v30 = vadd.f32 %v958_v28, %v957_v57  ;;  %v764_v40 = vadd.f32 %v763_v51, %v762_v33  ;;  %v863_v57 = vmul.f32 %v1833_v18, %v1833_v18  ;;  %v980_v51 = vsel %vm673_vm3, %v862_v27, 0.0 }
 0x14e   :  { %v789_v18 = vsel %vm673_vm3, %v1913_v21, 0.0 }
 0x14f   :  { %v961_v36 = vadd.f32 %v960_v53, %v959_v30  ;;  %v766_v32 = vadd.f32 %v765_v60, %v764_v40  ;;  %v982_v53 = vsel %vm673_vm3, %v863_v57, 0.0  ;;  %v865_v60 = vmul.f32 %v1913_v21, %v1913_v21 }
 0x150   :  { %v793_v21 = vsel %vm673_vm3, %v1983_v43, 0.0 }
 0x151   :  { %v963_v42 = vadd.f32 %v962_v55, %v961_v36  ;;  %v768_v1 = vadd.f32 %v767_v23, %v766_v32  ;;  %v984_v32 = vsel %vm673_vm3, %v864_v31, 0.0 }
 0x153   :  { %v770_v46 = vadd.f32 %v769_v49, %v768_v1  ;;  %v965_v29 = vadd.f32 %v964_v47, %v963_v42  ;;  %v986_v42 = vsel %vm673_vm3, %v865_v60, 0.0  ;;  %v867_v1 = vmul.f32 %v1983_v43, %v1983_v43 }
 0x154   :  { %v988_v47 = vsel %vm673_vm3, %v866_v34, 0.0  ;;  %v797_v43 = vsel %vm673_vm3, %v2039_v48, 0.0 }
 0x155   :  { %v772_v62 = vadd.f32 %v771_v58, %v770_v46  ;;  %v967_v12 = vadd.f32 %v966_v52, %v965_v29  ;;  %v868_v46 = vmul.f32 %v2007_v11, %v2007_v11  ;;  %v990_v58 = vsel %vm673_vm3, %v867_v1, 0.0 }
 0x156   :  { %v799_v11 = vsel %vm673_vm3, %v2063_v10, 0.0 }
 0x157   :  { %v774_v3 = vadd.f32 %v773_v41, %v772_v62  ;;  %v969_v54 = vadd.f32 %v968_v8, %v967_v12  ;;  %v992_v8 = vsel %vm673_vm3, %v868_v46, 0.0  ;;  %v870_v41 = vmul.f32 %v2063_v10, %v2063_v10 }
 0x159   :  { %v776_v6 = vadd.f32 %v775_v50, %v774_v3  ;;  %v971_v13 = vadd.f32 %v970_v61, %v969_v54  ;;  %v994_v54 = vsel %vm673_vm3, %v869_v63, 0.0  ;;  %v996_v0 = vsel %vm673_vm3, %v870_v41, 0.0 }
 0x15b   :  { %v778_v24 = vadd.f32 %v777_v59, %v776_v6  ;;  %v973_v9 = vadd.f32 %v972_v7, %v971_v13 }
 0x15d   :  { %v780_v37 = vadd.f32 %v779_v4, %v778_v24  ;;  %v975_v19 = vadd.f32 %v974_v25, %v973_v9 }
 0x15f   :  { %v977_v16 = vadd.f32 %v976_v2, %v975_v19  ;;  %v782_v44 = vadd.f32 %v781_v14, %v780_v37 }
 0x161   :  { %v784_v33 = vadd.f32 %v783_v26, %v782_v44  ;;  %v979_v28 = vadd.f32 %v978_v56, %v977_v16 }
 0x163   :  { %v786_v30 = vadd.f32 %v785_v5, %v784_v33  ;;  %v981_v40 = vadd.f32 %v980_v51, %v979_v28 }
 0x165   :  { %v788_v45 = vadd.f32 %v787_v35, %v786_v30  ;;  %v983_v36 = vadd.f32 %v982_v53, %v981_v40 }
 0x167   :  { %v790_v55 = vadd.f32 %v789_v18, %v788_v45  ;;  %v985_v23 = vadd.f32 %v984_v32, %v983_v36 }
 0x169   :  { %v792_v49 = vadd.f32 %v791_v38, %v790_v55  ;;  %v987_v20 = vadd.f32 %v986_v42, %v985_v23 }
 0x16b   :  { %v989_v29 = vadd.f32 %v988_v47, %v987_v20  ;;  %v794_v52 = vadd.f32 %v793_v21, %v792_v49 }
 0x16d   :  { %v991_v62 = vadd.f32 %v990_v58, %v989_v29  ;;  %v796_v12 = vadd.f32 %v795_v22, %v794_v52 }
 0x16f   :  { %v993_v39 = vadd.f32 %v992_v8, %v991_v62  ;;  %v798_v3 = vadd.f32 %v797_v43, %v796_v12 }
 0x171   :  { %v995_v61 = vadd.f32 %v994_v54, %v993_v39  ;;  %v800_v50 = vadd.f32 %v799_v11, %v798_v3 }
 0x173   :  { %v801_v6 = vrot.slane %v800_v50, 4  ;;  %v997_v13 = vadd.f32 %v996_v0, %v995_v61 }
 0x175   :  { %v802_v7 = vadd.f32 %v801_v6, %v800_v50  ;;  %v998_v59 = vrot.slane %v997_v13, 4 }
 0x177   :  { %v803_v15 = vrot.slane %v802_v7, 2  ;;  %v999_v48 = vadd.f32 %v998_v59, %v997_v13 }
 0x179   :  { %v804_v24 = vadd.f32 %v803_v15, %v802_v7  ;;  %v1000_v9 = vrot.slane %v999_v48, 2 }
 0x17b   :  { %v805_v25 = vrot.slane %v804_v24, 1  ;;  %v1001_v4 = vadd.f32 %v1000_v9, %v999_v48 }
 0x17d   :  { %v1002_v17 = vrot.slane %v1001_v4, 1  ;;  %v806_v37 = vadd.f32 %v805_v25, %v804_v24 }
 0x17f   :  { %v1003_v19 = vadd.f32 %v1002_v17, %v1001_v4 }
 0x181   :  { %v1005_v10 = vsel %vm1004_vm4, %v806_v37, %v1003_v19 }
 0x182   :  { %1007 = vst.msk [vmem:[%s2180_s3] sm:$0x3] %vm1006_vm5, %v1005_v10 }

// kernel: unet_up_forward.3
= control target key start
LH: loop header
LB: loop body
LE: loop exit
PB: predicated region body
PF: predicated region fallthrough
CT: control target
= control target key end

     0   :  { %s312_s0 = inlined_call_operand.vmem [shape: bf16[8,2048], index: 0, kind: input, shape index: {}]   ;;  %s313_s1 = inlined_call_operand.vmem [shape: f32[1,2048], index: 1, kind: input, shape index: {}]   ;;  %s314_s2 = inlined_call_operand.vmem [shape: f32[1,2048], index: 2, kind: input, shape index: {}]   ;;  %s315_s3 = inlined_call_operand.vmem [shape: f32[8,2048], index: 3, kind: output, shape index: {}]  }
   0x1   :  { %v14_v0 = vld [vmem:[%s312_s0] sm:$0xff]  ;;  %v15_v7 = vld [vmem:[%s312_s0 + $0x8] sm:$0xff]  ;;  %v16_v8 = vld [vmem:[%s312_s0 + $0x10] sm:$0xff] }
   0x2   :  { %v38_v1 = vld [vmem:[%s313_s1] sm:$0xff]  ;;  %v22_v3 = vunpack.c.l.bf16 %v14_v0  ;;  %v23_v6 = vunpack.c.h.bf16 %v14_v0  ;;  %v24_v11 = vunpack.c.l.bf16 %v15_v7  ;;  %v25_v15 = vunpack.c.h.bf16 %v15_v7  ;;  %v17_v25 = vld [vmem:[%s312_s0 + $0x18] sm:$0xff]  ;;  %v230_v39 = vld [vmem:[%s313_s1 + $0x8] sm:$0xff] }
   0x3   :  { %v207_v2 = vld [vmem:[%s314_s2] sm:$0xff]  ;;  %v42_v4 = vperm.slane %v38_v1, 0  ;;  %v43_v9 = vperm.slane %v38_v1, 1  ;;  %v44_v12 = vperm.slane %v38_v1, 2  ;;  %v45_v16 = vperm.slane %v38_v1, 3  ;;  %v239_v44 = vld [vmem:[%s314_s2 + $0x8] sm:$0xff] }
   0x4   :  { %v94_v5 = vperm.slane %v207_v2, 0  ;;  %v95_v10 = vperm.slane %v207_v2, 1  ;;  %v96_v14 = vperm.slane %v207_v2, 2  ;;  %v97_v19 = vperm.slane %v207_v2, 3  ;;  %v18_v38 = vld [vmem:[%s312_s0 + $0x20] sm:$0xff]  ;;  %v19_v53 = vld [vmem:[%s312_s0 + $0x28] sm:$0xff] }
   0x5   :  { %v74_v13 = vmul.f32 %v42_v4, %v22_v3  ;;  %v75_v17 = vmul.f32 %v43_v9, %v23_v6  ;;  %v76_v18 = vmul.f32 %v44_v12, %v24_v11  ;;  %v26_v20 = vunpack.c.l.bf16 %v16_v8 }
   0x6   :  { %v77_v22 = vmul.f32 %v45_v16, %v25_v15  ;;  %v46_v23 = vperm.slane %v38_v1, 4  ;;  %v98_v24 = vperm.slane %v207_v2, 4  ;;  %v27_v28 = vunpack.c.h.bf16 %v16_v8  ;;  %v21_v15 = vld [vmem:[%s312_s0 + $0x38] sm:$0xff] }
   0x7   :  { %v126_v21 = vadd.f32 %v94_v5, %v74_v13  ;;  %v127_v26 = vadd.f32 %v95_v10, %v75_v17  ;;  %v128_v27 = vadd.f32 %v96_v14, %v76_v18  ;;  %v47_v29 = vperm.slane %v38_v1, 5 }
   0x8   :  { %v129_v31 = vadd.f32 %v97_v19, %v77_v22  ;;  %v78_v32 = vmul.f32 %v46_v23, %v26_v20  ;;  %v99_v33 = vperm.slane %v207_v2, 5  ;;  %v28_v37 = vunpack.c.l.bf16 %v17_v25 }
   0x9   :  { %v142_v30 = vmax.f32 %v126_v21, 0.0  ;;  %v143_v34 = vmax.f32 %v127_v26, 0.0  ;;  %v144_v35 = vmax.f32 %v128_v27, 0.0  ;;  %v79_v36 = vmul.f32 %v47_v29, %v27_v28 }
   0xa   :  { %v145_v40 = vmax.f32 %v129_v31, 0.0  ;;  %v130_v41 = vadd.f32 %v98_v24, %v78_v32  ;;  %v48_v42 = vperm.slane %v38_v1, 6  ;;  %v100_v43 = vperm.slane %v207_v2, 6 }
   0xb   :  { %158 = vst [vmem:[%s315_s3] sm:$0xff] %v142_v30  ;;  %v131_v45 = vadd.f32 %v99_v33, %v79_v36  ;;  %v29_v46 = vunpack.c.h.bf16 %v17_v25  ;;  %v49_v47 = vperm.slane %v38_v1, 7  ;;  %v101_v48 = vperm.slane %v207_v2, 7  ;;  %v20_v2 = vld [vmem:[%s312_s0 + $0x30] sm:$0xff] }
   0xc   :  { %159 = vst [vmem:[%s315_s3 + $0x8] sm:$0xff] %v143_v34  ;;  %v146_v49 = vmax.f32 %v130_v41, 0.0  ;;  %v80_v50 = vmul.f32 %v48_v42, %v28_v37  ;;  %v30_v51 = vunpack.c.l.bf16 %v18_v38  ;;  %v50_v52 = vperm.slane %v230_v39, 0 }
   0xd   :  { %160 = vst [vmem:[%s315_s3 + $0x10] sm:$0xff] %v144_v35  ;;  %v147_v54 = vmax.f32 %v131_v45, 0.0  ;;  %v81_v55 = vmul.f32 %v49_v47, %v29_v46  ;;  %v102_v56 = vperm.slane %v239_v44, 0  ;;  %v31_v57 = vunpack.c.h.bf16 %v18_v38 }
   0xe   :  { %161 = vst [vmem:[%s315_s3 + $0x18] sm:$0xff] %v145_v40  ;;  %v132_v58 = vadd.f32 %v100_v43, %v80_v50  ;;  %v82_v59 = vmul.f32 %v50_v52, %v30_v51  ;;  %v51_v60 = vperm.slane %v230_v39, 1  ;;  %v103_v61 = vperm.slane %v239_v44, 1 }
   0xf   :  { %162 = vst [vmem:[%s315_s3 + $0x20] sm:$0xff] %v146_v49  ;;  %v133_v62 = vadd.f32 %v101_v48, %v81_v55  ;;  %v32_v63 = vunpack.c.l.bf16 %v19_v53  ;;  %v52_v0 = vperm.slane %v230_v39, 2  ;;  %v104_v1 = vperm.slane %v239_v44, 2 }
  0x10   :  { %163 = vst [vmem:[%s315_s3 + $0x28] sm:$0xff] %v147_v54  ;;  %v148_v3 = vmax.f32 %v132_v58, 0.0  ;;  %v134_v4 = vadd.f32 %v102_v56, %v82_v59  ;;  %v83_v5 = vmul.f32 %v51_v60, %v31_v57  ;;  %v33_v6 = vunpack.c.h.bf16 %v19_v53 }
  0x11   :  { %v149_v7 = vmax.f32 %v133_v62, 0.0  ;;  %v84_v8 = vmul.f32 %v52_v0, %v32_v63  ;;  %v53_v9 = vperm.slane %v230_v39, 3  ;;  %v105_v10 = vperm.slane %v239_v44, 3 }
  0x12   :  { %164 = vst [vmem:[%s315_s3 + $0x30] sm:$0xff] %v148_v3  ;;  %v150_v11 = vmax.f32 %v134_v4, 0.0  ;;  %v135_v12 = vadd.f32 %v103_v61, %v83_v5  ;;  %v34_v13 = vunpack.c.l.bf16 %v20_v2  ;;  %v54_v14 = vperm.slane %v230_v39, 4 }
  0x13   :  { %165 = vst [vmem:[%s315_s3 + $0x38] sm:$0xff] %v149_v7  ;;  %v136_v16 = vadd.f32 %v104_v1, %v84_v8  ;;  %v85_v17 = vmul.f32 %v53_v9, %v33_v6  ;;  %v106_v18 = vperm.slane %v239_v44, 4  ;;  %v35_v19 = vunpack.c.h.bf16 %v20_v2 }
  0x14   :  { %166 = vst [vmem:[%s315_s3 + $0x40] sm:$0xff] %v150_v11  ;;  %v151_v20 = vmax.f32 %v135_v12, 0.0  ;;  %v86_v21 = vmul.f32 %v54_v14, %v34_v13  ;;  %v55_v22 = vperm.slane %v230_v39, 5  ;;  %v107_v23 = vperm.slane %v239_v44, 5 }
  0x15   :  { %v152_v24 = vmax.f32 %v136_v16, 0.0  ;;  %v137_v25 = vadd.f32 %v105_v10, %v85_v17  ;;  %v36_v26 = vunpack.c.l.bf16 %v21_v15  ;;  %v56_v27 = vperm.slane %v230_v39, 6 }
  0x16   :  { %167 = vst [vmem:[%s315_s3 + $0x48] sm:$0xff] %v151_v20  ;;  %v138_v28 = vadd.f32 %v106_v18, %v86_v21  ;;  %v87_v29 = vmul.f32 %v55_v22, %v35_v19  ;;  %v108_v30 = vperm.slane %v239_v44, 6  ;;  %v37_v31 = vunpack.c.h.bf16 %v21_v15 }
  0x17   :  { %168 = vst [vmem:[%s315_s3 + $0x50] sm:$0xff] %v152_v24  ;;  %v153_v32 = vmax.f32 %v137_v25, 0.0  ;;  %v88_v33 = vmul.f32 %v56_v27, %v36_v26  ;;  %v57_v34 = vperm.slane %v230_v39, 7  ;;  %v109_v35 = vperm.slane %v239_v44, 7 }
  0x18   :  { %v154_v36 = vmax.f32 %v138_v28, 0.0  ;;  %v139_v37 = vadd.f32 %v107_v23, %v87_v29 }
  0x19   :  { %169 = vst [vmem:[%s315_s3 + $0x58] sm:$0xff] %v153_v32  ;;  %v140_v38 = vadd.f32 %v108_v30, %v88_v33  ;;  %v89_v40 = vmul.f32 %v57_v34, %v37_v31 }
  0x1a   :  { %170 = vst [vmem:[%s315_s3 + $0x60] sm:$0xff] %v154_v36  ;;  %v155_v41 = vmax.f32 %v139_v37, 0.0 }
  0x1b   :  { %v156_v42 = vmax.f32 %v140_v38, 0.0  ;;  %v141_v43 = vadd.f32 %v109_v35, %v89_v40 }
  0x1c   :  { %171 = vst [vmem:[%s315_s3 + $0x68] sm:$0xff] %v155_v41 }
  0x1d   :  { %172 = vst [vmem:[%s315_s3 + $0x70] sm:$0xff] %v156_v42  ;;  %v157_v39 = vmax.f32 %v141_v43, 0.0 }
  0x1f   :  { %173 = vst [vmem:[%s315_s3 + $0x78] sm:$0xff] %v157_v39 }

</bundles_post_ra>
